<compile_context>
chip_gen: v7x
topology: tpu7x:2x2x1
jax: 0.10.0
libtpu: 0.0.40
codegen_flags: <defaults>
</compile_context>

<pallas_src>
import numpy as np
import jax
import jax.numpy as jnp
from jax.experimental import pallas as pl
from jax.experimental.pallas import tpu as pltpu


# ---------------------------------------------------------------------------
# Host-side helpers
# ---------------------------------------------------------------------------
def _bilinear_matrix_align_corners(n_in, n_out):
    """(n_out, n_in) interpolation matrix for 1-D bilinear, align_corners=True."""
    U = np.zeros((n_out, n_in), dtype=np.float32)
    if n_in == 1:
        U[:, 0] = 1.0
        return U
    src = np.arange(n_out, dtype=np.float64) * (n_in - 1) / (n_out - 1)
    lo = np.minimum(np.floor(src).astype(np.int64), n_in - 2)
    frac = src - lo
    idx = np.arange(n_out)
    U[idx, lo] = (1.0 - frac).astype(np.float32)
    U[idx, lo + 1] = frac.astype(np.float32)
    return U


# ---------------------------------------------------------------------------
# Fused Up.forward (bilinear=True path), one pallas_call
# ---------------------------------------------------------------------------
def up_forward(x1, x2, params):
    """x1: (N, C1, H1, W1), x2: (N, C2, H, W)  ->  (N, Cout, H, W)."""
    N, C1, H1, W1 = x1.shape
    N2, C2, H, W = x2.shape
    assert N2 == N
    Hout, Wout = 2 * H1, 2 * W1
    diffY, diffX = H - Hout, W - Wout
    assert diffY >= 0 and diffX >= 0, "crop case (negative diff) not supported"
    py0, px0 = diffY // 2, diffX // 2
    Cin = C1 + C2
    Cmid = params["w1"].shape[-1]
    Cout = params["w2"].shape[-1]
    assert params["w1"].shape == (3, 3, Cin, Cmid)
    assert params["w2"].shape == (3, 3, Cmid, Cout)

    Wp = W + 2                       # padded row stride
    HWp = H * Wp                     # conv GEMM columns (2 garbage cols per row, masked/stripped)
    S2 = (H + 2) * Wp + 2            # flat padded image + 2 guard elements for the corner taps
    f32, act = jnp.float32, jnp.bfloat16

    # ---- host-built operators (tiny) -------------------------------------------------------
    # Upsample operator with the pad offsets + padded row stride folded in: column
    # (ho+py0+1)*Wp + (wo+px0+1) holds the bilinear weights of upsampled pixel (ho,wo);
    # every other column (halo, diff-pad region, guard) is zero -> one full-width store.
    uh = _bilinear_matrix_align_corners(H1, Hout)                    # (Hout, H1)
    uw = _bilinear_matrix_align_corners(W1, Wout)                    # (Wout, W1)
    up_dense = np.kron(uh.T, uw.T)                                   # (H1*W1, Hout*Wout)
    ho = np.repeat(np.arange(Hout), Wout)
    wo = np.tile(np.arange(Wout), Hout)
    up_pad = np.zeros((H1 * W1, S2), np.float32)
    up_pad[:, (ho + py0 + 1) * Wp + (wo + px0 + 1)] = up_dense
    # 0/1 embedding operator that zero-pads x2 into the same flat padded layout.
    r = np.repeat(np.arange(H), W)
    c = np.tile(np.arange(W), H)
    emb = np.zeros((H * W, S2), np.float32)
    emb[np.arange(H * W), (r + 1) * Wp + (c + 1)] = 1.0
    # Valid-column mask: kills the 2 garbage columns per row before they land in pad2.
    colmask = jnp.asarray((np.arange(HWp) % Wp < W).astype(np.float32).reshape(1, HWp))

    # Per-tap conv weights with BN scale folded in; bf16 operands for the MXU.
    w1 = np.asarray(params["w1"], np.float32)                        # (3,3,Cin,Cmid)
    w2 = np.asarray(params["w2"], np.float32)                        # (3,3,Cmid,Cout)
    s1 = np.asarray(params["scale1"], np.float32)
    s2 = np.asarray(params["scale2"], np.float32)
    w1t = jnp.asarray(np.transpose(w1, (0, 1, 3, 2)).reshape(9, Cmid, Cin)
                      * s1[None, :, None], act)                      # (9, Cmid, Cin)
    w2t = jnp.asarray(np.transpose(w2, (0, 1, 3, 2)).reshape(9, Cout, Cmid)
                      * s2[None, :, None], act)                      # (9, Cout, Cmid)
    b1 = jnp.asarray(params["bias1"], f32).reshape(Cmid, 1)
    b2 = jnp.asarray(params["bias2"], f32).reshape(Cout, 1)
    up_pad = jnp.asarray(up_pad)
    emb = jnp.asarray(emb)

    # Free (metadata-only) reshapes: spatial goes into the lane dimension.
    x1f = x1.astype(f32).reshape(N, C1, H1 * W1)
    x2f = x2.astype(f32).reshape(N, C2, H * W)

    def kernel(x1_ref, x2_ref, up_ref, emb_ref, w1_ref, b1_ref,
               w2_ref, b2_ref, mask_ref, o_ref, pad1, pad2):
        # --- upsample+diff-pad (x1) and zero-pad (x2): one GEMM + one lane-dense store each ---
        x1p = jnp.dot(x1_ref[0], up_ref[...], preferred_element_type=f32)    # (C1, S2)
        x2p = jnp.dot(x2_ref[0], emb_ref[...], preferred_element_type=f32)   # (C2, S2)
        pad1[0:C2, :] = x2p.astype(act)
        pad1[C2:Cin, :] = x1p.astype(act)

        # --- conv1 (3x3, pad=1): 9 accumulating partial GEMMs over shifted slices (no im2col) ---
        h1 = jnp.dot(w1_ref[0], pad1[:, 0:HWp], preferred_element_type=f32)
        for t in range(1, 9):
            off = (t // 3) * Wp + (t % 3)
            h1 = h1 + jnp.dot(w1_ref[t], pad1[:, off:off + HWp],
                              preferred_element_type=f32)
        y1 = jnp.maximum(h1 + b1_ref[...], 0.0) * mask_ref[...]     # fused BN bias + ReLU

        # --- conv1 -> padded conv2 input: border-only memset + ONE overlapping lane-dense store
        zrow = jnp.zeros((Cmid, Wp + 1), act)
        pad2[:, 0:Wp + 1] = zrow                        # top halo row + left pad of row 1
        pad2[:, (H + 1) * Wp + 1:S2] = zrow             # rest of bottom halo row + guard
        pad2[:, Wp + 1:Wp + 1 + HWp] = y1.astype(act)   # masked zeros land on pad positions

        # --- conv2 (3x3, pad=1): same partial-GEMM structure ---
        h2 = jnp.dot(w2_ref[0], pad2[:, 0:HWp], preferred_element_type=f32)
        for t in range(1, 9):
            off = (t // 3) * Wp + (t % 3)
            h2 = h2 + jnp.dot(w2_ref[t], pad2[:, off:off + HWp],
                              preferred_element_type=f32)
        y2 = jnp.maximum(h2 + b2_ref[...], 0.0)

        # Lane-dense output block (Cout, H*Wp); pad columns stripped in the wrapper.
        o_ref[0, :, :] = y2

    out = pl.pallas_call(
        kernel,
        out_shape=jax.ShapeDtypeStruct((N, Cout, HWp), f32),
        grid=(N,),
        in_specs=[
            pl.BlockSpec((1, C1, H1 * W1), lambda n: (n, 0, 0)),
            pl.BlockSpec((1, C2, H * W), lambda n: (n, 0, 0)),
            pl.BlockSpec((H1 * W1, S2), lambda n: (0, 0)),
            pl.BlockSpec((H * W, S2), lambda n: (0, 0)),
            pl.BlockSpec((9, Cmid, Cin), lambda n: (0, 0, 0)),
            pl.BlockSpec((Cmid, 1), lambda n: (0, 0)),
            pl.BlockSpec((9, Cout, Cmid), lambda n: (0, 0, 0)),
            pl.BlockSpec((Cout, 1), lambda n: (0, 0)),
            pl.BlockSpec((1, HWp), lambda n: (0, 0)),
        ],
        out_specs=pl.BlockSpec((1, Cout, HWp), lambda n: (n, 0, 0)),
        scratch_shapes=[
            pltpu.VMEM((Cin, S2), act),     # padded concat(x2, up(x1))  (conv1 input)
            pltpu.VMEM((Cmid, S2), act),    # padded conv1 output        (conv2 input)
        ],
        compiler_params=pltpu.CompilerParams(
            dimension_semantics=("parallel",),          # batch across TCs
            vmem_limit_bytes=32 * 1024 * 1024),
    )(x1f, x2f, up_pad, emb, w1t, b1, w2t, b2, colmask)

    # Strip the 2 pad columns per row (cheap XLA slice) -> (N, Cout, H, W).
    return out.reshape(N, Cout, H, Wp)[:, :, :, :W]


# ---------------------------------------------------------------------------
# Pure-JAX reference (sanity check of the Pallas path)
# ---------------------------------------------------------------------------
def _ref_upsample(x):
    N, C, H, W = x.shape
    Ho, Wo = 2 * H, 2 * W
    sy = jnp.arange(Ho) * (H - 1) / (Ho - 1)
    sx = jnp.arange(Wo) * (W - 1) / (Wo - 1)
    y0 = jnp.clip(jnp.floor(sy).astype(jnp.int32), 0, H - 2)
    x0 = jnp.clip(jnp.floor(sx).astype(jnp.int32), 0, W - 2)
    fy = (sy - y0)[None, None, :, None]
    fx = (sx - x0)[None, None, None, :]
    top = x[:, :, y0, :] * (1 - fy) + x[:, :, y0 + 1, :] * fy
    return top[:, :, :, x0] * (1 - fx) + top[:, :, :, x0 + 1] * fx


def _ref_conv_bn_relu(x_nchw, w_hwio, scale, bias):
    w_oihw = jnp.transpose(w_hwio, (3, 2, 0, 1))
    y = jax.lax.conv_general_dilated(
        x_nchw, w_oihw, (1, 1), "SAME",
        dimension_numbers=("NCHW", "OIHW", "NCHW"))
    y = y * scale[None, :, None, None] + bias[None, :, None, None]
    return jnp.maximum(y, 0.0)


def _ref_forward(x1, x2, params):
    x1u = _ref_upsample(x1)
    x = jnp.concatenate([x2, x1u], axis=1)
    y = _ref_conv_bn_relu(x, params["w1"], params["scale1"], params["bias1"])
    return _ref_conv_bn_relu(y, params["w2"], params["scale2"], params["bias2"])


# ---------------------------------------------------------------------------
if __name__ == "__main__":
    # Up(in_channels=8, out_channels=4, bilinear=True)
    #   -> up: bilinear x2 (align_corners=True); conv: DoubleConv(8, 4, mid_channels=4)
    in_channels, out_channels = 8, 4
    mid_channels = in_channels // 2          # 4
    N, H1, W1 = 2, 8, 8                      # x1 spatial; x2 spatial = 16x16
    C_half = in_channels // 2                # 4 channels each for x1 and x2

    key = jax.random.PRNGKey(0)
    k1, k2, k3, k4 = jax.random.split(key, 4)
    x1 = jax.random.normal(k1, (N, C_half, H1, W1), jnp.float32)
    x2 = jax.random.normal(k2, (N, C_half, 2 * H1, 2 * W1), jnp.float32)

    # Conv weights random; BN at PyTorch default init, eval-mode running stats folded
    # into per-channel scale/bias (scale is further folded into the conv weights on host).
    eps = 1e-5
    w1 = jax.random.normal(k3, (3, 3, in_channels, mid_channels), jnp.float32) * 0.1
    w2 = jax.random.normal(k4, (3, 3, mid_channels, out_channels), jnp.float32) * 0.1
    gamma1, beta1 = jnp.ones((mid_channels,)), jnp.zeros((mid_channels,))
    gamma2, beta2 = jnp.ones((out_channels,)), jnp.zeros((out_channels,))
    rmean1, rvar1 = jnp.zeros((mid_channels,)), jnp.ones((mid_channels,))
    rmean2, rvar2 = jnp.zeros((out_channels,)), jnp.ones((out_channels,))
    params = {
        "w1": w1,
        "scale1": gamma1 / jnp.sqrt(rvar1 + eps),
        "bias1": beta1 - rmean1 * gamma1 / jnp.sqrt(rvar1 + eps),
        "w2": w2,
        "scale2": gamma2 / jnp.sqrt(rvar2 + eps),
        "bias2": beta2 - rmean2 * gamma2 / jnp.sqrt(rvar2 + eps),
    }

    out = jax.block_until_ready(up_forward(x1, x2, params))
    assert out.shape == (N, out_channels, 2 * H1, 2 * W1), out.shape

    ref = jax.block_until_ready(_ref_forward(x1, x2, params))
    # Conv MXU operands are bf16 (f32 accumulation) per perf review -> loosened tolerance.
    np.testing.assert_allclose(np.asarray(out), np.asarray(ref), rtol=3e-2, atol=3e-2)

    print("KERNEL_OK")
</pallas_src>

<mosaic_0001>
module attributes {stable_mosaic.version = 11 : i64} {
  func.func @kernel(%arg0: i32, %arg1: memref<1x4x64xf32, #tpu.memory_space<vmem>>, %arg2: memref<1x4x256xf32, #tpu.memory_space<vmem>>, %arg3: memref<64x326xf32, #tpu.memory_space<vmem>>, %arg4: memref<256x326xf32, #tpu.memory_space<vmem>>, %arg5: memref<9x4x8xbf16, #tpu.memory_space<vmem>>, %arg6: memref<4x1xf32, #tpu.memory_space<vmem>>, %arg7: memref<9x4x4xbf16, #tpu.memory_space<vmem>>, %arg8: memref<4x1xf32, #tpu.memory_space<vmem>>, %arg9: memref<1x288xf32, #tpu.memory_space<vmem>>, %arg10: memref<1x4x288xf32, #tpu.memory_space<vmem>>, %arg11: memref<8x326xbf16, #tpu.memory_space<vmem>>, %arg12: memref<4x326xbf16, #tpu.memory_space<vmem>>) attributes {dimension_semantics = [#tpu.dimension_semantics<parallel>], iteration_bounds = array<i64: 2>, scalar_prefetch = 0 : i64, scratch_operands = 2 : i64, tpu.core_type = #tpu.core_type<tc>, window_params = [{transform_indices = @transform_0, window_bounds = array<i64: 1, 4, 64>}, {transform_indices = @transform_1, window_bounds = array<i64: 1, 4, 256>}, {pipeline_mode = #tpu.pipeline_mode<synchronous>, transform_indices = @transform_2, window_bounds = array<i64: 64, 326>}, {pipeline_mode = #tpu.pipeline_mode<synchronous>, transform_indices = @transform_3, window_bounds = array<i64: 256, 326>}, {pipeline_mode = #tpu.pipeline_mode<synchronous>, transform_indices = @transform_4, window_bounds = array<i64: 9, 4, 8>}, {pipeline_mode = #tpu.pipeline_mode<synchronous>, transform_indices = @transform_5, window_bounds = array<i64: 4, 1>}, {pipeline_mode = #tpu.pipeline_mode<synchronous>, transform_indices = @transform_6, window_bounds = array<i64: 9, 4, 4>}, {pipeline_mode = #tpu.pipeline_mode<synchronous>, transform_indices = @transform_7, window_bounds = array<i64: 4, 1>}, {pipeline_mode = #tpu.pipeline_mode<synchronous>, transform_indices = @transform_8, window_bounds = array<i64: 1, 288>}, {transform_indices = @transform_9, window_bounds = array<i64: 1, 4, 288>}]} {
    %c0 = arith.constant 0 : index
    %c0_0 = arith.constant 0 : index
    %c0_1 = arith.constant 0 : index
    %0 = vector.load %arg1[%c0, %c0_0, %c0_1] : memref<1x4x64xf32, #tpu.memory_space<vmem>>, vector<1x4x64xf32>
    %1 = vector.shape_cast %0 : vector<1x4x64xf32> to vector<4x64xf32>
    %c0_2 = arith.constant 0 : index
    %c0_3 = arith.constant 0 : index
    %2 = vector.load %arg3[%c0_2, %c0_3] : memref<64x326xf32, #tpu.memory_space<vmem>>, vector<64x326xf32>
    %cst = arith.constant dense<0.000000e+00> : vector<4x326xf32>
    %3 = tpu.matmul %1, %2, %cst {dimension_numbers = #tpu.dot_dimension_numbers<[1], [0], [0], [1], [0, 0, 1, 1], [], []>} : vector<4x64xf32>, vector<64x326xf32>, vector<4x326xf32> -> vector<4x326xf32>
    %c0_4 = arith.constant 0 : index
    %c0_5 = arith.constant 0 : index
    %c0_6 = arith.constant 0 : index
    %4 = vector.load %arg2[%c0_4, %c0_5, %c0_6] : memref<1x4x256xf32, #tpu.memory_space<vmem>>, vector<1x4x256xf32>
    %5 = vector.shape_cast %4 : vector<1x4x256xf32> to vector<4x256xf32>
    %c0_7 = arith.constant 0 : index
    %c0_8 = arith.constant 0 : index
    %6 = vector.load %arg4[%c0_7, %c0_8] : memref<256x326xf32, #tpu.memory_space<vmem>>, vector<256x326xf32>
    %cst_9 = arith.constant dense<0.000000e+00> : vector<4x326xf32>
    %7 = tpu.matmul %5, %6, %cst_9 {dimension_numbers = #tpu.dot_dimension_numbers<[1], [0], [0], [1], [0, 0, 1, 1], [], []>} : vector<4x256xf32>, vector<256x326xf32>, vector<4x326xf32> -> vector<4x326xf32>
    %8 = arith.truncf %7 : vector<4x326xf32> to vector<4x326xbf16>
    %c0_10 = arith.constant 0 : index
    %c0_11 = arith.constant 0 : index
    %9 = vector.load %arg11[%c0_10, %c0_11] : memref<8x326xbf16, #tpu.memory_space<vmem>>, vector<4x326xbf16>
    tpu.vector_store %arg11[%c0_10, %c0_11], %8 {strides = array<i32>} : memref<8x326xbf16, #tpu.memory_space<vmem>>, vector<4x326xbf16>,
    %10 = arith.truncf %3 : vector<4x326xf32> to vector<4x326xbf16>
    %c4 = arith.constant 4 : index
    %c0_12 = arith.constant 0 : index
    %11 = vector.load %arg11[%c4, %c0_12] : memref<8x326xbf16, #tpu.memory_space<vmem>>, vector<4x326xbf16>
    tpu.vector_store %arg11[%c4, %c0_12], %10 {strides = array<i32>} : memref<8x326xbf16, #tpu.memory_space<vmem>>, vector<4x326xbf16>,
    %c0_13 = arith.constant 0 : index
    %c0_14 = arith.constant 0 : index
    %c0_15 = arith.constant 0 : index
    %12 = vector.load %arg5[%c0_13, %c0_14, %c0_15] : memref<9x4x8xbf16, #tpu.memory_space<vmem>>, vector<1x4x8xbf16>
    %13 = vector.shape_cast %12 : vector<1x4x8xbf16> to vector<4x8xbf16>
    %c0_16 = arith.constant 0 : index
    %c0_17 = arith.constant 0 : index
    %14 = vector.load %arg11[%c0_16, %c0_17] : memref<8x326xbf16, #tpu.memory_space<vmem>>, vector<8x288xbf16>
    %cst_18 = arith.constant dense<0.000000e+00> : vector<4x288xf32>
    %15 = tpu.matmul %13, %14, %cst_18 {dimension_numbers = #tpu.dot_dimension_numbers<[1], [0], [0], [1], [0, 0, 1, 1], [], []>} : vector<4x8xbf16>, vector<8x288xbf16>, vector<4x288xf32> -> vector<4x288xf32>
    %c1 = arith.constant 1 : index
    %c0_19 = arith.constant 0 : index
    %c0_20 = arith.constant 0 : index
    %16 = vector.load %arg5[%c1, %c0_19, %c0_20] : memref<9x4x8xbf16, #tpu.memory_space<vmem>>, vector<1x4x8xbf16>
    %17 = vector.shape_cast %16 : vector<1x4x8xbf16> to vector<4x8xbf16>
    %c0_21 = arith.constant 0 : index
    %c1_22 = arith.constant 1 : index
    %18 = vector.load %arg11[%c0_21, %c1_22] : memref<8x326xbf16, #tpu.memory_space<vmem>>, vector<8x288xbf16>
    %cst_23 = arith.constant dense<0.000000e+00> : vector<4x288xf32>
    %19 = tpu.matmul %17, %18, %cst_23 {dimension_numbers = #tpu.dot_dimension_numbers<[1], [0], [0], [1], [0, 0, 1, 1], [], []>} : vector<4x8xbf16>, vector<8x288xbf16>, vector<4x288xf32> -> vector<4x288xf32>
    %20 = arith.addf %15, %19 : vector<4x288xf32>
    %c2 = arith.constant 2 : index
    %c0_24 = arith.constant 0 : index
    %c0_25 = arith.constant 0 : index
    %21 = vector.load %arg5[%c2, %c0_24, %c0_25] : memref<9x4x8xbf16, #tpu.memory_space<vmem>>, vector<1x4x8xbf16>
    %22 = vector.shape_cast %21 : vector<1x4x8xbf16> to vector<4x8xbf16>
    %c0_26 = arith.constant 0 : index
    %c2_27 = arith.constant 2 : index
    %23 = vector.load %arg11[%c0_26, %c2_27] : memref<8x326xbf16, #tpu.memory_space<vmem>>, vector<8x288xbf16>
    %cst_28 = arith.constant dense<0.000000e+00> : vector<4x288xf32>
    %24 = tpu.matmul %22, %23, %cst_28 {dimension_numbers = #tpu.dot_dimension_numbers<[1], [0], [0], [1], [0, 0, 1, 1], [], []>} : vector<4x8xbf16>, vector<8x288xbf16>, vector<4x288xf32> -> vector<4x288xf32>
    %25 = arith.addf %20, %24 : vector<4x288xf32>
    %c3 = arith.constant 3 : index
    %c0_29 = arith.constant 0 : index
    %c0_30 = arith.constant 0 : index
    %26 = vector.load %arg5[%c3, %c0_29, %c0_30] : memref<9x4x8xbf16, #tpu.memory_space<vmem>>, vector<1x4x8xbf16>
    %27 = vector.shape_cast %26 : vector<1x4x8xbf16> to vector<4x8xbf16>
    %c0_31 = arith.constant 0 : index
    %c18 = arith.constant 18 : index
    %28 = vector.load %arg11[%c0_31, %c18] : memref<8x326xbf16, #tpu.memory_space<vmem>>, vector<8x288xbf16>
    %cst_32 = arith.constant dense<0.000000e+00> : vector<4x288xf32>
    %29 = tpu.matmul %27, %28, %cst_32 {dimension_numbers = #tpu.dot_dimension_numbers<[1], [0], [0], [1], [0, 0, 1, 1], [], []>} : vector<4x8xbf16>, vector<8x288xbf16>, vector<4x288xf32> -> vector<4x288xf32>
    %30 = arith.addf %25, %29 : vector<4x288xf32>
    %c4_33 = arith.constant 4 : index
    %c0_34 = arith.constant 0 : index
    %c0_35 = arith.constant 0 : index
    %31 = vector.load %arg5[%c4_33, %c0_34, %c0_35] : memref<9x4x8xbf16, #tpu.memory_space<vmem>>, vector<1x4x8xbf16>
    %32 = vector.shape_cast %31 : vector<1x4x8xbf16> to vector<4x8xbf16>
    %c0_36 = arith.constant 0 : index
    %c19 = arith.constant 19 : index
    %33 = vector.load %arg11[%c0_36, %c19] : memref<8x326xbf16, #tpu.memory_space<vmem>>, vector<8x288xbf16>
    %cst_37 = arith.constant dense<0.000000e+00> : vector<4x288xf32>
    %34 = tpu.matmul %32, %33, %cst_37 {dimension_numbers = #tpu.dot_dimension_numbers<[1], [0], [0], [1], [0, 0, 1, 1], [], []>} : vector<4x8xbf16>, vector<8x288xbf16>, vector<4x288xf32> -> vector<4x288xf32>
    %35 = arith.addf %30, %34 : vector<4x288xf32>
    %c5 = arith.constant 5 : index
    %c0_38 = arith.constant 0 : index
    %c0_39 = arith.constant 0 : index
    %36 = vector.load %arg5[%c5, %c0_38, %c0_39] : memref<9x4x8xbf16, #tpu.memory_space<vmem>>, vector<1x4x8xbf16>
    %37 = vector.shape_cast %36 : vector<1x4x8xbf16> to vector<4x8xbf16>
    %c0_40 = arith.constant 0 : index
    %c20 = arith.constant 20 : index
    %38 = vector.load %arg11[%c0_40, %c20] : memref<8x326xbf16, #tpu.memory_space<vmem>>, vector<8x288xbf16>
    %cst_41 = arith.constant dense<0.000000e+00> : vector<4x288xf32>
    %39 = tpu.matmul %37, %38, %cst_41 {dimension_numbers = #tpu.dot_dimension_numbers<[1], [0], [0], [1], [0, 0, 1, 1], [], []>} : vector<4x8xbf16>, vector<8x288xbf16>, vector<4x288xf32> -> vector<4x288xf32>
    %40 = arith.addf %35, %39 : vector<4x288xf32>
    %c6 = arith.constant 6 : index
    %c0_42 = arith.constant 0 : index
    %c0_43 = arith.constant 0 : index
    %41 = vector.load %arg5[%c6, %c0_42, %c0_43] : memref<9x4x8xbf16, #tpu.memory_space<vmem>>, vector<1x4x8xbf16>
    %42 = vector.shape_cast %41 : vector<1x4x8xbf16> to vector<4x8xbf16>
    %c0_44 = arith.constant 0 : index
    %c36 = arith.constant 36 : index
    %43 = vector.load %arg11[%c0_44, %c36] : memref<8x326xbf16, #tpu.memory_space<vmem>>, vector<8x288xbf16>
    %cst_45 = arith.constant dense<0.000000e+00> : vector<4x288xf32>
    %44 = tpu.matmul %42, %43, %cst_45 {dimension_numbers = #tpu.dot_dimension_numbers<[1], [0], [0], [1], [0, 0, 1, 1], [], []>} : vector<4x8xbf16>, vector<8x288xbf16>, vector<4x288xf32> -> vector<4x288xf32>
    %45 = arith.addf %40, %44 : vector<4x288xf32>
    %c7 = arith.constant 7 : index
    %c0_46 = arith.constant 0 : index
    %c0_47 = arith.constant 0 : index
    %46 = vector.load %arg5[%c7, %c0_46, %c0_47] : memref<9x4x8xbf16, #tpu.memory_space<vmem>>, vector<1x4x8xbf16>
    %47 = vector.shape_cast %46 : vector<1x4x8xbf16> to vector<4x8xbf16>
    %c0_48 = arith.constant 0 : index
    %c37 = arith.constant 37 : index
    %48 = vector.load %arg11[%c0_48, %c37] : memref<8x326xbf16, #tpu.memory_space<vmem>>, vector<8x288xbf16>
    %cst_49 = arith.constant dense<0.000000e+00> : vector<4x288xf32>
    %49 = tpu.matmul %47, %48, %cst_49 {dimension_numbers = #tpu.dot_dimension_numbers<[1], [0], [0], [1], [0, 0, 1, 1], [], []>} : vector<4x8xbf16>, vector<8x288xbf16>, vector<4x288xf32> -> vector<4x288xf32>
    %50 = arith.addf %45, %49 : vector<4x288xf32>
    %c8 = arith.constant 8 : index
    %c0_50 = arith.constant 0 : index
    %c0_51 = arith.constant 0 : index
    %51 = vector.load %arg5[%c8, %c0_50, %c0_51] : memref<9x4x8xbf16, #tpu.memory_space<vmem>>, vector<1x4x8xbf16>
    %52 = vector.shape_cast %51 : vector<1x4x8xbf16> to vector<4x8xbf16>
    %c0_52 = arith.constant 0 : index
    %c38 = arith.constant 38 : index
    %53 = vector.load %arg11[%c0_52, %c38] : memref<8x326xbf16, #tpu.memory_space<vmem>>, vector<8x288xbf16>
    %cst_53 = arith.constant dense<0.000000e+00> : vector<4x288xf32>
    %54 = tpu.matmul %52, %53, %cst_53 {dimension_numbers = #tpu.dot_dimension_numbers<[1], [0], [0], [1], [0, 0, 1, 1], [], []>} : vector<4x8xbf16>, vector<8x288xbf16>, vector<4x288xf32> -> vector<4x288xf32>
    %55 = arith.addf %50, %54 : vector<4x288xf32>
    %c0_54 = arith.constant 0 : index
    %c0_55 = arith.constant 0 : index
    %56 = vector.load %arg6[%c0_54, %c0_55] : memref<4x1xf32, #tpu.memory_space<vmem>>, vector<4x1xf32>
    %57 = vector.broadcast %56 : vector<4x1xf32> to vector<4x288xf32>
    %58 = arith.addf %55, %57 : vector<4x288xf32>
    %cst_56 = arith.constant 0.000000e+00 : f32
    %59 = vector.broadcast %cst_56 : f32 to vector<4x288xf32>
    %60 = arith.maximumf %58, %59 : vector<4x288xf32>
    %c0_57 = arith.constant 0 : index
    %c0_58 = arith.constant 0 : index
    %61 = vector.load %arg9[%c0_57, %c0_58] : memref<1x288xf32, #tpu.memory_space<vmem>>, vector<1x288xf32>
    %62 = vector.broadcast %61 : vector<1x288xf32> to vector<4x288xf32>
    %63 = arith.mulf %60, %62 : vector<4x288xf32>
    %cst_59 = arith.constant 0.000000e+00 : bf16
    %64 = vector.broadcast %cst_59 : bf16 to vector<4x19xbf16>
    %c0_60 = arith.constant 0 : index
    %c0_61 = arith.constant 0 : index
    %65 = vector.load %arg12[%c0_60, %c0_61] : memref<4x326xbf16, #tpu.memory_space<vmem>>, vector<4x19xbf16>
    tpu.vector_store %arg12[%c0_60, %c0_61], %64 {strides = array<i32>} : memref<4x326xbf16, #tpu.memory_space<vmem>>, vector<4x19xbf16>,
    %c0_62 = arith.constant 0 : index
    %c307 = arith.constant 307 : index
    %66 = vector.load %arg12[%c0_62, %c307] : memref<4x326xbf16, #tpu.memory_space<vmem>>, vector<4x19xbf16>
    tpu.vector_store %arg12[%c0_62, %c307], %64 {strides = array<i32>} : memref<4x326xbf16, #tpu.memory_space<vmem>>, vector<4x19xbf16>,
    %67 = arith.truncf %63 : vector<4x288xf32> to vector<4x288xbf16>
    %c0_63 = arith.constant 0 : index
    %c19_64 = arith.constant 19 : index
    %68 = vector.load %arg12[%c0_63, %c19_64] : memref<4x326xbf16, #tpu.memory_space<vmem>>, vector<4x288xbf16>
    tpu.vector_store %arg12[%c0_63, %c19_64], %67 {strides = array<i32>} : memref<4x326xbf16, #tpu.memory_space<vmem>>, vector<4x288xbf16>,
    %c0_65 = arith.constant 0 : index
    %c0_66 = arith.constant 0 : index
    %c0_67 = arith.constant 0 : index
    %69 = vector.load %arg7[%c0_65, %c0_66, %c0_67] : memref<9x4x4xbf16, #tpu.memory_space<vmem>>, vector<1x4x4xbf16>
    %70 = vector.shape_cast %69 : vector<1x4x4xbf16> to vector<4x4xbf16>
    %c0_68 = arith.constant 0 : index
    %c0_69 = arith.constant 0 : index
    %71 = vector.load %arg12[%c0_68, %c0_69] : memref<4x326xbf16, #tpu.memory_space<vmem>>, vector<4x288xbf16>
    %cst_70 = arith.constant dense<0.000000e+00> : vector<4x288xf32>
    %72 = tpu.matmul %70, %71, %cst_70 {dimension_numbers = #tpu.dot_dimension_numbers<[1], [0], [0], [1], [0, 0, 1, 1], [], []>} : vector<4x4xbf16>, vector<4x288xbf16>, vector<4x288xf32> -> vector<4x288xf32>
    %c1_71 = arith.constant 1 : index
    %c0_72 = arith.constant 0 : index
    %c0_73 = arith.constant 0 : index
    %73 = vector.load %arg7[%c1_71, %c0_72, %c0_73] : memref<9x4x4xbf16, #tpu.memory_space<vmem>>, vector<1x4x4xbf16>
    %74 = vector.shape_cast %73 : vector<1x4x4xbf16> to vector<4x4xbf16>
    %c0_74 = arith.constant 0 : index
    %c1_75 = arith.constant 1 : index
    %75 = vector.load %arg12[%c0_74, %c1_75] : memref<4x326xbf16, #tpu.memory_space<vmem>>, vector<4x288xbf16>
    %cst_76 = arith.constant dense<0.000000e+00> : vector<4x288xf32>
    %76 = tpu.matmul %74, %75, %cst_76 {dimension_numbers = #tpu.dot_dimension_numbers<[1], [0], [0], [1], [0, 0, 1, 1], [], []>} : vector<4x4xbf16>, vector<4x288xbf16>, vector<4x288xf32> -> vector<4x288xf32>
    %77 = arith.addf %72, %76 : vector<4x288xf32>
    %c2_77 = arith.constant 2 : index
    %c0_78 = arith.constant 0 : index
    %c0_79 = arith.constant 0 : index
    %78 = vector.load %arg7[%c2_77, %c0_78, %c0_79] : memref<9x4x4xbf16, #tpu.memory_space<vmem>>, vector<1x4x4xbf16>
    %79 = vector.shape_cast %78 : vector<1x4x4xbf16> to vector<4x4xbf16>
    %c0_80 = arith.constant 0 : index
    %c2_81 = arith.constant 2 : index
    %80 = vector.load %arg12[%c0_80, %c2_81] : memref<4x326xbf16, #tpu.memory_space<vmem>>, vector<4x288xbf16>
    %cst_82 = arith.constant dense<0.000000e+00> : vector<4x288xf32>
    %81 = tpu.matmul %79, %80, %cst_82 {dimension_numbers = #tpu.dot_dimension_numbers<[1], [0], [0], [1], [0, 0, 1, 1], [], []>} : vector<4x4xbf16>, vector<4x288xbf16>, vector<4x288xf32> -> vector<4x288xf32>
    %82 = arith.addf %77, %81 : vector<4x288xf32>
    %c3_83 = arith.constant 3 : index
    %c0_84 = arith.constant 0 : index
    %c0_85 = arith.constant 0 : index
    %83 = vector.load %arg7[%c3_83, %c0_84, %c0_85] : memref<9x4x4xbf16, #tpu.memory_space<vmem>>, vector<1x4x4xbf16>
    %84 = vector.shape_cast %83 : vector<1x4x4xbf16> to vector<4x4xbf16>
    %c0_86 = arith.constant 0 : index
    %c18_87 = arith.constant 18 : index
    %85 = vector.load %arg12[%c0_86, %c18_87] : memref<4x326xbf16, #tpu.memory_space<vmem>>, vector<4x288xbf16>
    %cst_88 = arith.constant dense<0.000000e+00> : vector<4x288xf32>
    %86 = tpu.matmul %84, %85, %cst_88 {dimension_numbers = #tpu.dot_dimension_numbers<[1], [0], [0], [1], [0, 0, 1, 1], [], []>} : vector<4x4xbf16>, vector<4x288xbf16>, vector<4x288xf32> -> vector<4x288xf32>
    %87 = arith.addf %82, %86 : vector<4x288xf32>
    %c4_89 = arith.constant 4 : index
    %c0_90 = arith.constant 0 : index
    %c0_91 = arith.constant 0 : index
    %88 = vector.load %arg7[%c4_89, %c0_90, %c0_91] : memref<9x4x4xbf16, #tpu.memory_space<vmem>>, vector<1x4x4xbf16>
    %89 = vector.shape_cast %88 : vector<1x4x4xbf16> to vector<4x4xbf16>
    %c0_92 = arith.constant 0 : index
    %c19_93 = arith.constant 19 : index
    %90 = vector.load %arg12[%c0_92, %c19_93] : memref<4x326xbf16, #tpu.memory_space<vmem>>, vector<4x288xbf16>
    %cst_94 = arith.constant dense<0.000000e+00> : vector<4x288xf32>
    %91 = tpu.matmul %89, %90, %cst_94 {dimension_numbers = #tpu.dot_dimension_numbers<[1], [0], [0], [1], [0, 0, 1, 1], [], []>} : vector<4x4xbf16>, vector<4x288xbf16>, vector<4x288xf32> -> vector<4x288xf32>
    %92 = arith.addf %87, %91 : vector<4x288xf32>
    %c5_95 = arith.constant 5 : index
    %c0_96 = arith.constant 0 : index
    %c0_97 = arith.constant 0 : index
    %93 = vector.load %arg7[%c5_95, %c0_96, %c0_97] : memref<9x4x4xbf16, #tpu.memory_space<vmem>>, vector<1x4x4xbf16>
    %94 = vector.shape_cast %93 : vector<1x4x4xbf16> to vector<4x4xbf16>
    %c0_98 = arith.constant 0 : index
    %c20_99 = arith.constant 20 : index
    %95 = vector.load %arg12[%c0_98, %c20_99] : memref<4x326xbf16, #tpu.memory_space<vmem>>, vector<4x288xbf16>
    %cst_100 = arith.constant dense<0.000000e+00> : vector<4x288xf32>
    %96 = tpu.matmul %94, %95, %cst_100 {dimension_numbers = #tpu.dot_dimension_numbers<[1], [0], [0], [1], [0, 0, 1, 1], [], []>} : vector<4x4xbf16>, vector<4x288xbf16>, vector<4x288xf32> -> vector<4x288xf32>
    %97 = arith.addf %92, %96 : vector<4x288xf32>
    %c6_101 = arith.constant 6 : index
    %c0_102 = arith.constant 0 : index
    %c0_103 = arith.constant 0 : index
    %98 = vector.load %arg7[%c6_101, %c0_102, %c0_103] : memref<9x4x4xbf16, #tpu.memory_space<vmem>>, vector<1x4x4xbf16>
    %99 = vector.shape_cast %98 : vector<1x4x4xbf16> to vector<4x4xbf16>
    %c0_104 = arith.constant 0 : index
    %c36_105 = arith.constant 36 : index
    %100 = vector.load %arg12[%c0_104, %c36_105] : memref<4x326xbf16, #tpu.memory_space<vmem>>, vector<4x288xbf16>
    %cst_106 = arith.constant dense<0.000000e+00> : vector<4x288xf32>
    %101 = tpu.matmul %99, %100, %cst_106 {dimension_numbers = #tpu.dot_dimension_numbers<[1], [0], [0], [1], [0, 0, 1, 1], [], []>} : vector<4x4xbf16>, vector<4x288xbf16>, vector<4x288xf32> -> vector<4x288xf32>
    %102 = arith.addf %97, %101 : vector<4x288xf32>
    %c7_107 = arith.constant 7 : index
    %c0_108 = arith.constant 0 : index
    %c0_109 = arith.constant 0 : index
    %103 = vector.load %arg7[%c7_107, %c0_108, %c0_109] : memref<9x4x4xbf16, #tpu.memory_space<vmem>>, vector<1x4x4xbf16>
    %104 = vector.shape_cast %103 : vector<1x4x4xbf16> to vector<4x4xbf16>
    %c0_110 = arith.constant 0 : index
    %c37_111 = arith.constant 37 : index
    %105 = vector.load %arg12[%c0_110, %c37_111] : memref<4x326xbf16, #tpu.memory_space<vmem>>, vector<4x288xbf16>
    %cst_112 = arith.constant dense<0.000000e+00> : vector<4x288xf32>
    %106 = tpu.matmul %104, %105, %cst_112 {dimension_numbers = #tpu.dot_dimension_numbers<[1], [0], [0], [1], [0, 0, 1, 1], [], []>} : vector<4x4xbf16>, vector<4x288xbf16>, vector<4x288xf32> -> vector<4x288xf32>
    %107 = arith.addf %102, %106 : vector<4x288xf32>
    %c8_113 = arith.constant 8 : index
    %c0_114 = arith.constant 0 : index
    %c0_115 = arith.constant 0 : index
    %108 = vector.load %arg7[%c8_113, %c0_114, %c0_115] : memref<9x4x4xbf16, #tpu.memory_space<vmem>>, vector<1x4x4xbf16>
    %109 = vector.shape_cast %108 : vector<1x4x4xbf16> to vector<4x4xbf16>
    %c0_116 = arith.constant 0 : index
    %c38_117 = arith.constant 38 : index
    %110 = vector.load %arg12[%c0_116, %c38_117] : memref<4x326xbf16, #tpu.memory_space<vmem>>, vector<4x288xbf16>
    %cst_118 = arith.constant dense<0.000000e+00> : vector<4x288xf32>
    %111 = tpu.matmul %109, %110, %cst_118 {dimension_numbers = #tpu.dot_dimension_numbers<[1], [0], [0], [1], [0, 0, 1, 1], [], []>} : vector<4x4xbf16>, vector<4x288xbf16>, vector<4x288xf32> -> vector<4x288xf32>
    %112 = arith.addf %107, %111 : vector<4x288xf32>
    %c0_119 = arith.constant 0 : index
    %c0_120 = arith.constant 0 : index
    %113 = vector.load %arg8[%c0_119, %c0_120] : memref<4x1xf32, #tpu.memory_space<vmem>>, vector<4x1xf32>
    %114 = vector.broadcast %113 : vector<4x1xf32> to vector<4x288xf32>
    %115 = arith.addf %112, %114 : vector<4x288xf32>
    %cst_121 = arith.constant 0.000000e+00 : f32
    %116 = vector.broadcast %cst_121 : f32 to vector<4x288xf32>
    %117 = arith.maximumf %115, %116 : vector<4x288xf32>
    %c0_122 = arith.constant 0 : index
    %c0_123 = arith.constant 0 : index
    %c0_124 = arith.constant 0 : index
    %118 = vector.load %arg10[%c0_122, %c0_123, %c0_124] : memref<1x4x288xf32, #tpu.memory_space<vmem>>, vector<1x4x288xf32>
    %119 = vector.shape_cast %118 : vector<1x4x288xf32> to vector<4x288xf32>
    %120 = vector.shape_cast %117 : vector<4x288xf32> to vector<1x4x288xf32>
    tpu.vector_store %arg10[%c0_122, %c0_123, %c0_124], %120 {strides = array<i32>} : memref<1x4x288xf32, #tpu.memory_space<vmem>>, vector<1x4x288xf32>,
    return
  }
  func.func @transform_0(%arg0: i32) -> (i32, i32, i32) {
    %c0_i32 = arith.constant 0 : i32
    %c0_i32_0 = arith.constant 0 : i32
    %c0_i32_1 = arith.constant 0 : i32
    return %arg0, %c0_i32, %c0_i32_0 : i32, i32, i32
  }
  func.func @transform_1(%arg0: i32) -> (i32, i32, i32) {
    %c0_i32 = arith.constant 0 : i32
    %c0_i32_0 = arith.constant 0 : i32
    %c0_i32_1 = arith.constant 0 : i32
    return %arg0, %c0_i32, %c0_i32_0 : i32, i32, i32
  }
  func.func @transform_2(%arg0: i32) -> (i32, i32) {
    %c0_i32 = arith.constant 0 : i32
    %c0_i32_0 = arith.constant 0 : i32
    %c0_i32_1 = arith.constant 0 : i32
    return %c0_i32, %c0_i32_0 : i32, i32
  }
  func.func @transform_3(%arg0: i32) -> (i32, i32) {
    %c0_i32 = arith.constant 0 : i32
    %c0_i32_0 = arith.constant 0 : i32
    %c0_i32_1 = arith.constant 0 : i32
    return %c0_i32, %c0_i32_0 : i32, i32
  }
  func.func @transform_4(%arg0: i32) -> (i32, i32, i32) {
    %c0_i32 = arith.constant 0 : i32
    %c0_i32_0 = arith.constant 0 : i32
    %c0_i32_1 = arith.constant 0 : i32
    %c0_i32_2 = arith.constant 0 : i32
    return %c0_i32, %c0_i32_0, %c0_i32_1 : i32, i32, i32
  }
  func.func @transform_5(%arg0: i32) -> (i32, i32) {
    %c0_i32 = arith.constant 0 : i32
    %c0_i32_0 = arith.constant 0 : i32
    %c0_i32_1 = arith.constant 0 : i32
    return %c0_i32, %c0_i32_0 : i32, i32
  }
  func.func @transform_6(%arg0: i32) -> (i32, i32, i32) {
    %c0_i32 = arith.constant 0 : i32
    %c0_i32_0 = arith.constant 0 : i32
    %c0_i32_1 = arith.constant 0 : i32
    %c0_i32_2 = arith.constant 0 : i32
    return %c0_i32, %c0_i32_0, %c0_i32_1 : i32, i32, i32
  }
  func.func @transform_7(%arg0: i32) -> (i32, i32) {
    %c0_i32 = arith.constant 0 : i32
    %c0_i32_0 = arith.constant 0 : i32
    %c0_i32_1 = arith.constant 0 : i32
    return %c0_i32, %c0_i32_0 : i32, i32
  }
  func.func @transform_8(%arg0: i32) -> (i32, i32) {
    %c0_i32 = arith.constant 0 : i32
    %c0_i32_0 = arith.constant 0 : i32
    %c0_i32_1 = arith.constant 0 : i32
    return %c0_i32, %c0_i32_0 : i32, i32
  }
  func.func @transform_9(%arg0: i32) -> (i32, i32, i32) {
    %c0_i32 = arith.constant 0 : i32
    %c0_i32_0 = arith.constant 0 : i32
    %c0_i32_1 = arith.constant 0 : i32
    return %arg0, %c0_i32, %c0_i32_0 : i32, i32, i32
  }
}

</mosaic_0001>

<bundles_post_ra>
// kernel: tpu_custom_call.1
= control target key start
LH: loop header
LB: loop body
LE: loop exit
PB: predicated region body
PF: predicated region fallthrough
CT: control target
= control target key end

     0   :  { %s4502_s0 = inlined_call_operand.vmem [shape: f32[2,4,64], index: 0, kind: input, shape index: {}]   ;;  %s4503_s1 = inlined_call_operand.vmem [shape: f32[2,4,256], index: 1, kind: input, shape index: {}]   ;;  %s4504_s2 = inlined_call_operand.vmem [shape: f32[64,326], index: 2, kind: input, shape index: {}]   ;;  %s4505_s3 = inlined_call_operand.vmem [shape: f32[256,326], index: 3, kind: input, shape index: {}]   ;;  %s4506_s4 = inlined_call_operand.vmem [shape: bf16[9,4,8], index: 4, kind: input, shape index: {}]   ;;  %s4507_s5 = inlined_call_operand.vmem [shape: f32[4,1], index: 5, kind: input, shape index: {}]   ;;  %s4508_s6 = inlined_call_operand.vmem [shape: bf16[9,4,4], index: 6, kind: input, shape index: {}]   ;;  %s4509_s7 = inlined_call_operand.vmem [shape: f32[4,1], index: 7, kind: input, shape index: {}]   ;;  %s4510_s8 = inlined_call_operand.vmem [shape: f32[1,288], index: 8, kind: input, shape index: {}]   ;;  %s4511_s9 = inlined_call_operand.hbm [shape: f32[2,4,288], index: 9, kind: output, shape index: {}]  }
   0x1   :  { %4512 = sst [smem:[#allocation8_spill]] %s4502_s0 }
   0x2   :  { %14 = vsyncpa [#allocation5], 0 }
   0x3   :  { %16 = vsyncpa [#allocation5 + $0x1], 0  ;;  %s3637_s30 = smov 0   ;;  %s3639_s10 = smov 0  }
   0x4   :  { %s3641_s11 = smov 0   ;;  %s3643_s12 = smov 0  }
   0x5 LB: > { %s3658_s13 = sadd.s32 4294967295, %s3570_s12   ;;  %s3013_s14 = sadd.s32 4294967294, %s3570_s12   ;;  %s3570_s12 = sphi %s3643_s12, %s4521_s12   ;;  %s3566_s11 = sphi %s3641_s11, %s4520_s11   ;;  %s3562_s10 = sphi %s3639_s10, %s4519_s10   ;;  %s3558_s30 = sphi %s3637_s30, %s4518_s30  }
   0x6   : > { %s3662_s15 = sadd.s32 1, %s3570_s12   ;;  %s228_s16 = sadd.s32 1, %s3566_s11 }
   0x7   : > { %s225_s17 = ssub.s32 %s3570_s12, %s3662_s15  ;;  %p238_p0 = scmp.ne.s32.totalorder %s3566_s11, %s3562_s10 }
   0x8   : > { %p226_p1 = scmp.eq.s32.totalorder %s225_s17, 0  ;;  %p239_p2 = scmp.eq.s32.totalorder %s3658_s13, 1 }
   0x9   : > { %p244_p3 = scmp.ne.s32.totalorder %s3562_s10, %s3558_s30  ;;  %p245_p4 = scmp.eq.s32.totalorder %s3013_s14, 1 }
   0xa   : > { %s3673_s18 = scalar_select %p226_p1, %s3566_s11, %s228_s16  }
   0xb   : > { %p3675_p5 = por %p239_p2, %p238_p0  ;;  %p3679_p6 = por %p245_p4, %p244_p3 }
   0xc   : > { %4513 = sst [smem:[#allocation7_spill]] %s3673_s18  ;;  %p3016_p7 = scmp.ge.s32.totalorder %s3570_s12, 1 }
   0xd   : > { %p299_p8 = scmp.lt.s32.totalorder %s3570_s12, 3 }
   0xf   : > { %p300_p9 = pnand %p3016_p7, %p299_p8 }
  0x10   : > { %v351_v0 = vld [vmem:[%s4504_s2 + $0x8] sm:$0xff] (!%p300_p9)  ;;  %v354_v1 = vld [vmem:[%s4504_s2 + $0x20] sm:$0xff] (!%p300_p9)  ;;  %v353_v4 = vld [vmem:[%s4504_s2 + $0x18] sm:$0xff] (!%p300_p9)  ;;  %v3572_v5 = vmov (!%p300_p9), 0.0|0.0   ;;  %v3573_v8 = vmov (!%p300_p9), 0.0   ;;  %p339_p10 = scmp.lt.s32.totalorder (!%p300_p9), %s3658_s13, 1 }
  0x11   : > { %303 = sbr.rel (%p300_p9) target bundleno = 1305 (0x519), region = 56  ;;  %v350_v2 = vld [vmem:[%s4504_s2] sm:$0xff] (!%p300_p9)  ;;  %v3315_v3 = vpack.c.bf16 (!%p300_p9), %v354_v1, %v351_v0  ;;  %3331 = vmatprep.subr.bf16.mxu1 (!%p300_p9), %v3572_v5  ;;  %v352_v6 = vld [vmem:[%s4504_s2 + $0x10] sm:$0xff] (!%p300_p9)  ;;  %v355_v7 = vld [vmem:[%s4504_s2 + $0x28] sm:$0xff] (!%p300_p9)  ;;  %442 = vmatprep.mubr.f32.mxu0 (!%p300_p9), %v3573_v8  ;;  %vm3574_vm0 = vmmov (!%p300_p9), 0   ;;  %s4516_s0 = sld [smem:[#allocation8_spill]] (!%p300_p9) }
  0x12   : > { %v3317_v9 = vpack.c.bf16 (!%p300_p9), %v353_v4, %v350_v2  ;;  %v3332_v10 = vpack.c.bf16 (!%p300_p9), %v355_v7, %v352_v6  ;;  %v357_v11 = vld [vmem:[%s4504_s2 + $0x38] sm:$0xff] (!%p300_p9)  ;;  %v360_v12 = vld [vmem:[%s4504_s2 + $0x50] sm:$0xff] (!%p300_p9)  ;;  %3204 = vmatprep.mubr.msk.f32.mxu1 (!%p300_p9), %vm3574_vm0, %v3573_v8  ;;  %v359_v15 = vld [vmem:[%s4504_s2 + $0x48] sm:$0xff] (!%p300_p9)  ;;  %vm374_vm1 = vcmask (!%p300_p9), 523264   ;;  %vm774_vm2 = vcmask (!%p300_p9), 566272   ;;  %s3575_s21 = smov (!%p300_p9), 127  }
  0x13   : > { %v356_v13 = vld [vmem:[%s4504_s2 + $0x30] sm:$0xff] (!%p300_p9)  ;;  %3316 = vmatprep.subr.bf16.mxu0 (!%p300_p9), %v3315_v3  ;;  %v3319_v14 = vpack.c.bf16 (!%p300_p9), %v360_v12, %v357_v11  ;;  %v358_v16 = vld [vmem:[%s4504_s2 + $0x40] sm:$0xff] (!%p300_p9)  ;;  %v361_v17 = vld [vmem:[%s4504_s2 + $0x58] sm:$0xff] (!%p300_p9)  ;;  %s3577_s22 = smov (!%p300_p9), 126   ;;  %s3578_s23 = smov (!%p300_p9), 110   ;;  %vm813_vm3 = vcmask (!%p300_p9), 1039360  }
  0x14   : > { %3318 = vmatpush1.bf16.msra.mxu0 (!%p300_p9), %v3317_v9  ;;  %3333 = vmatpush3.bf16.msra.mxu1 (!%p300_p9), %v3332_v10  ;;  %v3321_v18 = vpack.c.bf16 (!%p300_p9), %v359_v15, %v356_v13  ;;  %v3335_v19 = vpack.c.bf16 (!%p300_p9), %v361_v17, %v358_v16  ;;  %v363_v20 = vld [vmem:[%s4504_s2 + $0x68] sm:$0xff] (!%p300_p9)  ;;  %v366_v21 = vld [vmem:[%s4504_s2 + $0x80] sm:$0xff] (!%p300_p9)  ;;  %v365_v24 = vld [vmem:[%s4504_s2 + $0x78] sm:$0xff] (!%p300_p9)  ;;  %s3582_s26 = smov (!%p300_p9), 91   ;;  %s3583_s18 = smov (!%p300_p9), 90   ;;  %vm820_vm4 = vcmask (!%p300_p9), 1043456  }
  0x15   : > { %v362_v22 = vld [vmem:[%s4504_s2 + $0x60] sm:$0xff] (!%p300_p9)  ;;  %3320 = vmatprep.subr.bf16.mxu0 (!%p300_p9), %v3319_v14  ;;  %3334 = vmatprep.subr.bf16.mxu1 (!%p300_p9), %v3572_v5  ;;  %v3323_v23 = vpack.c.bf16 (!%p300_p9), %v366_v21, %v363_v20  ;;  %v364_v25 = vld [vmem:[%s4504_s2 + $0x70] sm:$0xff] (!%p300_p9)  ;;  %v367_v26 = vld [vmem:[%s4504_s2 + $0x88] sm:$0xff] (!%p300_p9)  ;;  %vm1012_vm5 = vcmask (!%p300_p9), 1031168   ;;  %vm816_vm6 = vcmask (!%p300_p9), 64512   ;;  %vm1119_vm7 = vcmask (!%p300_p9), 900096  }
  0x16   : > { %v369_v27 = vld [vmem:[%s4504_s2 + $0x98] sm:$0xff] (!%p300_p9)  ;;  %v372_v28 = vld [vmem:[%s4504_s2 + $0xb0] sm:$0xff] (!%p300_p9)  ;;  %v3325_v29 = vpack.c.bf16 (!%p300_p9), %v365_v24, %v362_v22  ;;  %v3338_v30 = vpack.c.bf16 (!%p300_p9), %v367_v26, %v364_v25  ;;  %v371_v32 = vld [vmem:[%s4504_s2 + $0xa8] sm:$0xff] (!%p300_p9)  ;;  %vm1226_vm8 = vcmask (!%p300_p9), 891904   ;;  %vm1333_vm9 = vcmask (!%p300_p9), 883712   ;;  %s3440_s17 = smul.u32 (!%p300_p9), 192, %s3658_s13 }
  0x17   : > { %v368_v31 = vld [vmem:[%s4504_s2 + $0x90] sm:$0xff] (!%p300_p9)  ;;  %v3327_v33 = vpack.c.bf16 (!%p300_p9), %v372_v28, %v369_v27  ;;  %v370_v34 = vld [vmem:[%s4504_s2 + $0xa0] sm:$0xff] (!%p300_p9)  ;;  %v373_v35 = vld [vmem:[%s4504_s2 + $0xb8] sm:$0xff] (!%p300_p9)  ;;  %vm1440_vm10 = vcmask (!%p300_p9), 752640   ;;  %vm1547_vm11 = vcmask (!%p300_p9), 744448   ;;  %vm1654_vm12 = vcmask (!%p300_p9), 736256  }
  0x18   : > { %s3752_s25 = scalar_select %p339_p10, %s3658_s13, 1  ;;  %3322 = vmatpush1.bf16.msra.mxu0 %v3321_v18  ;;  %3336 = vmatpush3.bf16.msra.mxu1 %v3335_v19  ;;  %v521_v36 = vld [vmem:[%s4505_s3 + $0x8] sm:$0xff]  ;;  %v524_v37 = vld [vmem:[%s4505_s3 + $0x20] sm:$0xff]  ;;  %v570_v38 = vld [vmem:[%s4505_s3 + $0x190] sm:$0xff]  ;;  %v3329_v40 = vpack.c.bf16 %v371_v32, %v368_v31  ;;  %v3341_v41 = vpack.c.bf16 %v373_v35, %v370_v34  ;;  %vm1785_vm13 = vcmask 148480   ;;  %vm1787_vm14 = vcmask 566680  }
  0x19   : > { %3324 = vmatprep.subr.bf16.mxu0 %v3323_v23  ;;  %3337 = vmatprep.subr.bf16.mxu1 %v3572_v5  ;;  %v573_v39 = vld [vmem:[%s4505_s3 + $0x1a8] sm:$0xff]  ;;  %v520_v42 = vld [vmem:[%s4505_s3] sm:$0xff]  ;;  %v523_v43 = vld [vmem:[%s4505_s3 + $0x18] sm:$0xff]  ;;  %v3343_v44 = vpack.c.bf16 %v524_v37, %v521_v36  ;;  %vm1817_vm15 = vcmask 1041560   ;;  %s3586_s13 = smov [#allocation4]  }
  0x1a   : > { %s3017_s24 = sshll.u32 %s3752_s25, 2  ;;  %v3407_v45 = vpack.c.bf16 %v573_v39, %v570_v38  ;;  %v522_v46 = vld [vmem:[%s4505_s3 + $0x10] sm:$0xff]  ;;  %v525_v47 = vld [vmem:[%s4505_s3 + $0x28] sm:$0xff]  ;;  %v527_v48 = vld [vmem:[%s4505_s3 + $0x38] sm:$0xff]  ;;  %v3345_v53 = vpack.c.bf16 %v523_v43, %v520_v42  ;;  %s3103_s14 = sshll.u32 %s3752_s25, 3 }
  0x1b   : > { %s342_s27 = scalar_lea.vmem %s4516_s0, %s3017_s24  ;;  %v530_v49 = vld [vmem:[%s4505_s3 + $0x50] sm:$0xff]  ;;  %v576_v50 = vld [vmem:[%s4505_s3 + $0x1c0] sm:$0xff]  ;;  %v579_v51 = vld [vmem:[%s4505_s3 + $0x1d8] sm:$0xff]  ;;  %v3409_v54 = vpack.c.bf16 %v525_v47, %v522_v46  ;;  %s347_s29 = scalar_lea.vmem %s4503_s1, %s3103_s14 }
  0x1c   : > { %3326 = vmatpush1.bf16.msra.mxu0 %v3325_v29  ;;  %3339 = vmatpush3.bf16.msra.mxu1 %v3338_v30  ;;  %v349_v52 = vld [vmem:[%s342_s27] sm:$0xf]  ;;  %v526_v55 = vld [vmem:[%s4505_s3 + $0x30] sm:$0xff]  ;;  %v529_v56 = vld [vmem:[%s4505_s3 + $0x48] sm:$0xff]  ;;  %v3347_v57 = vpack.c.bf16 %v530_v49, %v527_v48  ;;  %v3411_v58 = vpack.c.bf16 %v579_v51, %v576_v50  ;;  %s3579_s24 = smov 109   ;;  %s3580_s14 = smov 108  }
  0x1d   : > { %3328 = vmatprep.subr.bf16.mxu0 %v3327_v33  ;;  %3340 = vmatprep.subr.bf16.mxu1 %v3572_v5  ;;  %v528_v59 = vld [vmem:[%s4505_s3 + $0x40] sm:$0xff]  ;;  %v531_v60 = vld [vmem:[%s4505_s3 + $0x58] sm:$0xff]  ;;  %v533_v61 = vld [vmem:[%s4505_s3 + $0x68] sm:$0xff]  ;;  %v3349_v1 = vpack.c.bf16 %v529_v56, %v526_v55  ;;  %s3581_s25 = smov 92  }
  0x1e   : > { %v536_v62 = vld [vmem:[%s4505_s3 + $0x80] sm:$0xff]  ;;  %v582_v63 = vld [vmem:[%s4505_s3 + $0x1f0] sm:$0xff]  ;;  %v585_v0 = vld [vmem:[%s4505_s3 + $0x208] sm:$0xff]  ;;  %v3413_v2 = vpack.c.bf16 %v531_v60, %v528_v59 }
  0x1f   : > { %v532_v3 = vld [vmem:[%s4505_s3 + $0x60] sm:$0xff]  ;;  %v535_v4 = vld [vmem:[%s4505_s3 + $0x78] sm:$0xff]  ;;  %v3351_v5 = vpack.c.bf16 %v536_v62, %v533_v61  ;;  %v3415_v6 = vpack.c.bf16 %v585_v0, %v582_v63  ;;  %v534_v7 = vld [vmem:[%s4505_s3 + $0x70] sm:$0xff] }
  0x20   : > { %3330 = vmatpush1.bf16.msra.mxu0 %v3329_v40  ;;  %3342 = vmatpush3.bf16.msra.mxu1 %v3341_v41  ;;  %v537_v9 = vld [vmem:[%s4505_s3 + $0x88] sm:$0xff]  ;;  %v539_v10 = vld [vmem:[%s4505_s3 + $0x98] sm:$0xff]  ;;  %v542_v11 = vld [vmem:[%s4505_s3 + $0xb0] sm:$0xff]  ;;  %v3353_v14 = vpack.c.bf16 %v535_v4, %v532_v3 }
  0x21   : > { %3344 = vmatprep.subr.bf16.mxu0 %v3343_v44  ;;  %3408 = vmatprep.subr.bf16.mxu1 %v3407_v45  ;;  %v588_v12 = vld [vmem:[%s4505_s3 + $0x220] sm:$0xff]  ;;  %v591_v13 = vld [vmem:[%s4505_s3 + $0x238] sm:$0xff]  ;;  %v3417_v15 = vpack.c.bf16 %v537_v9, %v534_v7  ;;  %v538_v16 = vld [vmem:[%s4505_s3 + $0x90] sm:$0xff]  ;;  %v3355_v18 = vpack.c.bf16 %v542_v11, %v539_v10 }
  0x22   : > { %v541_v17 = vld [vmem:[%s4505_s3 + $0xa8] sm:$0xff]  ;;  %v3419_v19 = vpack.c.bf16 %v591_v13, %v588_v12  ;;  %v540_v20 = vld [vmem:[%s4505_s3 + $0xa0] sm:$0xff]  ;;  %v543_v21 = vld [vmem:[%s4505_s3 + $0xb8] sm:$0xff] }
  0x23   : > { %3020 = vmatmul.mubr.msk.f32.vlgmr.msra.gmra.mrb[0].mxu0 %vm374_vm1, %v349_v52  ;;  %3205 = vmatmul.mubr.msk.f32.vlgmr.msra.gmra.mrb[0].mxu1 %vm374_vm1, %v349_v52  ;;  %v545_v22 = vld [vmem:[%s4505_s3 + $0xc8] sm:$0xff]  ;;  %v548_v23 = vld [vmem:[%s4505_s3 + $0xe0] sm:$0xff]  ;;  %v594_v24 = vld [vmem:[%s4505_s3 + $0x250] sm:$0xff]  ;;  %v3357_v26 = vpack.c.bf16 %v541_v17, %v538_v16  ;;  %v3421_v27 = vpack.c.bf16 %v543_v21, %v540_v20  ;;  %vm1818_vm1 = vcmask 1043458  }
  0x24   : > { %3346 = vmatpush1.bf16.msra.mxu0 %v3345_v53  ;;  %3410 = vmatpush3.bf16.msra.mxu1 %v3409_v54  ;;  %v597_v25 = vld [vmem:[%s4505_s3 + $0x268] sm:$0xff]  ;;  %v544_v28 = vld [vmem:[%s4505_s3 + $0xc0] sm:$0xff]  ;;  %v547_v29 = vld [vmem:[%s4505_s3 + $0xd8] sm:$0xff]  ;;  %v3359_v30 = vpack.c.bf16 %v548_v23, %v545_v22 }
  0x25   : > { %3348 = vmatprep.subr.bf16.mxu0 %v3347_v57  ;;  %3412 = vmatprep.subr.bf16.mxu1 %v3411_v58  ;;  %v3423_v31 = vpack.c.bf16 %v597_v25, %v594_v24  ;;  %v546_v32 = vld [vmem:[%s4505_s3 + $0xd0] sm:$0xff]  ;;  %v549_v33 = vld [vmem:[%s4505_s3 + $0xe8] sm:$0xff]  ;;  %v551_v34 = vld [vmem:[%s4505_s3 + $0xf8] sm:$0xff]  ;;  %v3361_v39 = vpack.c.bf16 %v547_v29, %v544_v28 }
  0x26   : > { %v554_v35 = vld [vmem:[%s4505_s3 + $0x110] sm:$0xff]  ;;  %v600_v36 = vld [vmem:[%s4505_s3 + $0x280] sm:$0xff]  ;;  %v603_v37 = vld [vmem:[%s4505_s3 + $0x298] sm:$0xff]  ;;  %v3425_v40 = vpack.c.bf16 %v549_v33, %v546_v32 }
  0x27   : > { %v3908_v38 = vld [vmem:[%s347_s29] sm:$0xff]  ;;  %v550_v41 = vld [vmem:[%s4505_s3 + $0xf0] sm:$0xff]  ;;  %v553_v42 = vld [vmem:[%s4505_s3 + $0x108] sm:$0xff]  ;;  %v3363_v44 = vpack.c.bf16 %v554_v35, %v551_v34  ;;  %v3427_v45 = vpack.c.bf16 %v603_v37, %v600_v36  ;;  %s3585_s29 = smov 19  }
  0x28   : > { %3350 = vmatpush1.bf16.msra.mxu0 %v3349_v1  ;;  %3414 = vmatpush3.bf16.msra.mxu1 %v3413_v2  ;;  %v617_v43 = vcombine.high %v3908_v38, %v3908_v38  ;;  %v552_v46 = vld [vmem:[%s4505_s3 + $0x100] sm:$0xff]  ;;  %v555_v47 = vld [vmem:[%s4505_s3 + $0x118] sm:$0xff]  ;;  %v557_v48 = vld [vmem:[%s4505_s3 + $0x128] sm:$0xff]  ;;  %v3365_v52 = vpack.c.bf16 %v553_v42, %v550_v41 }
  0x29   : > { %3352 = vmatprep.subr.bf16.mxu0 %v3351_v5  ;;  %3416 = vmatprep.subr.bf16.mxu1 %v3415_v6  ;;  %v560_v49 = vld [vmem:[%s4505_s3 + $0x140] sm:$0xff]  ;;  %v606_v50 = vld [vmem:[%s4505_s3 + $0x2b0] sm:$0xff]  ;;  %v609_v51 = vld [vmem:[%s4505_s3 + $0x2c8] sm:$0xff]  ;;  %v3429_v53 = vpack.c.bf16 %v555_v47, %v552_v46 }
  0x2a   : > { %754 = vmatprep.mubr.f32.mxu1 %v617_v43  ;;  %683 = vmatprep.mubr.f32.mxu0 %v617_v43  ;;  %v556_v54 = vld [vmem:[%s4505_s3 + $0x120] sm:$0xff]  ;;  %v559_v55 = vld [vmem:[%s4505_s3 + $0x138] sm:$0xff]  ;;  %v3367_v56 = vpack.c.bf16 %v560_v49, %v557_v48  ;;  %v3431_v57 = vpack.c.bf16 %v609_v51, %v606_v50  ;;  %v558_v58 = vld [vmem:[%s4505_s3 + $0x130] sm:$0xff] }
  0x2b   : > { %v561_v59 = vld [vmem:[%s4505_s3 + $0x148] sm:$0xff]  ;;  %v563_v60 = vld [vmem:[%s4505_s3 + $0x158] sm:$0xff]  ;;  %v566_v61 = vld [vmem:[%s4505_s3 + $0x170] sm:$0xff]  ;;  %v3369_v0 = vpack.c.bf16 %v559_v55, %v556_v54 }
  0x2c   : > { %3354 = vmatpush1.bf16.msra.mxu0 %v3353_v14  ;;  %3418 = vmatpush3.bf16.msra.mxu1 %v3417_v15  ;;  %v612_v62 = vld [vmem:[%s4505_s3 + $0x2e0] sm:$0xff]  ;;  %v615_v63 = vld [vmem:[%s4505_s3 + $0x2f8] sm:$0xff]  ;;  %v3433_v1 = vpack.c.bf16 %v561_v59, %v558_v58  ;;  %v562_v2 = vld [vmem:[%s4505_s3 + $0x150] sm:$0xff]  ;;  %v3371_v3 = vpack.c.bf16 %v566_v61, %v563_v60 }
  0x2d   : > { %3356 = vmatprep.subr.bf16.mxu0 %v3355_v18  ;;  %3420 = vmatprep.subr.bf16.mxu1 %v3419_v19  ;;  %v565_v4 = vld [vmem:[%s4505_s3 + $0x168] sm:$0xff]  ;;  %v3435_v5 = vpack.c.bf16 %v615_v63, %v612_v62  ;;  %v564_v6 = vld [vmem:[%s4505_s3 + $0x160] sm:$0xff]  ;;  %v567_v7 = vld [vmem:[%s4505_s3 + $0x178] sm:$0xff] }
  0x2e   : > { %v569_v9 = vld [vmem:[%s4505_s3 + $0x188] sm:$0xff]  ;;  %v572_v10 = vld [vmem:[%s4505_s3 + $0x1a0] sm:$0xff]  ;;  %v3373_v11 = vpack.c.bf16 %v565_v4, %v562_v2  ;;  %v3437_v12 = vpack.c.bf16 %v567_v7, %v564_v6  ;;  %v571_v15 = vld [vmem:[%s4505_s3 + $0x198] sm:$0xff] }
  0x2f   : > { %v3375_v13 = vpack.c.bf16 %v572_v10, %v569_v9  ;;  %v568_v14 = vld [vmem:[%s4505_s3 + $0x180] sm:$0xff]  ;;  %v575_v16 = vld [vmem:[%s4505_s3 + $0x1b8] sm:$0xff]  ;;  %v578_v17 = vld [vmem:[%s4505_s3 + $0x1d0] sm:$0xff]  ;;  %v3576_v10 = vmov 0  }
  0x30   : > { %3358 = vmatpush1.bf16.msra.mxu0 %v3357_v26  ;;  %3422 = vmatpush3.bf16.msra.mxu1 %v3421_v27  ;;  %v3377_v18 = vpack.c.bf16 %v571_v15, %v568_v14  ;;  %v3379_v19 = vpack.c.bf16 %v578_v17, %v575_v16  ;;  %v574_v20 = vld [vmem:[%s4505_s3 + $0x1b0] sm:$0xff]  ;;  %v577_v21 = vld [vmem:[%s4505_s3 + $0x1c8] sm:$0xff]  ;;  %v584_v23 = vld [vmem:[%s4505_s3 + $0x200] sm:$0xff]  ;;  %1786 = vst.msk [vmem:[#allocation3] sm:$0x3] %vm1785_vm13, %v3576_v10 }
  0x31   : > { %3360 = vmatprep.subr.bf16.mxu0 %v3359_v30  ;;  %3424 = vmatprep.subr.bf16.mxu1 %v3423_v31  ;;  %v581_v22 = vld [vmem:[%s4505_s3 + $0x1e8] sm:$0xff]  ;;  %v3381_v24 = vpack.c.bf16 %v577_v21, %v574_v20  ;;  %v580_v26 = vld [vmem:[%s4505_s3 + $0x1e0] sm:$0xff]  ;;  %v583_v27 = vld [vmem:[%s4505_s3 + $0x1f8] sm:$0xff]  ;;  %1788 = vst.msk [vmem:[#allocation3 + $0x4] sm:$0x3] %vm1787_vm14, %v3576_v10  ;;  %vm1856_vm14 = vcmask 1041408  }
  0x32   : > { %v3383_v25 = vpack.c.bf16 %v584_v23, %v581_v22  ;;  %v587_v28 = vld [vmem:[%s4505_s3 + $0x218] sm:$0xff]  ;;  %v590_v29 = vld [vmem:[%s4505_s3 + $0x230] sm:$0xff]  ;;  %v3385_v30 = vpack.c.bf16 %v583_v27, %v580_v26  ;;  %v589_v33 = vld [vmem:[%s4505_s3 + $0x228] sm:$0xff]  ;;  %3494 = vset.pattern.permute.xlu0 %v3576_v10  ;;  %3495 = vset.pattern.permute.xlu1 %v3576_v10 }
  0x33   : > { %v3387_v31 = vpack.c.bf16 %v590_v29, %v587_v28  ;;  %v586_v32 = vld [vmem:[%s4505_s3 + $0x210] sm:$0xff]  ;;  %v593_v34 = vld [vmem:[%s4505_s3 + $0x248] sm:$0xff]  ;;  %v596_v35 = vld [vmem:[%s4505_s3 + $0x260] sm:$0xff] }
  0x34   : > { %3362 = vmatpush1.bf16.msra.mxu0 %v3361_v39  ;;  %3426 = vmatpush3.bf16.msra.mxu1 %v3425_v40  ;;  %v3389_v36 = vpack.c.bf16 %v589_v33, %v586_v32  ;;  %v3391_v37 = vpack.c.bf16 %v596_v35, %v593_v34  ;;  %v592_v39 = vld [vmem:[%s4505_s3 + $0x240] sm:$0xff]  ;;  %v595_v40 = vld [vmem:[%s4505_s3 + $0x258] sm:$0xff]  ;;  %v602_v42 = vld [vmem:[%s4505_s3 + $0x290] sm:$0xff] }
  0x35   : > { %3364 = vmatprep.subr.bf16.mxu0 %v3363_v44  ;;  %3428 = vmatprep.subr.bf16.mxu1 %v3427_v45  ;;  %v599_v41 = vld [vmem:[%s4505_s3 + $0x278] sm:$0xff]  ;;  %v3393_v43 = vpack.c.bf16 %v595_v40, %v592_v39  ;;  %v598_v45 = vld [vmem:[%s4505_s3 + $0x270] sm:$0xff]  ;;  %v601_v46 = vld [vmem:[%s4505_s3 + $0x288] sm:$0xff] }
  0x36   : > { %v3395_v44 = vpack.c.bf16 %v602_v42, %v599_v41  ;;  %v605_v47 = vld [vmem:[%s4505_s3 + $0x2a8] sm:$0xff]  ;;  %v608_v48 = vld [vmem:[%s4505_s3 + $0x2c0] sm:$0xff]  ;;  %v3397_v49 = vpack.c.bf16 %v601_v46, %v598_v45  ;;  %v614_v54 = vld [vmem:[%s4505_s3 + $0x2f0] sm:$0xff] }
  0x37   : > { %v3399_v50 = vpack.c.bf16 %v608_v48, %v605_v47  ;;  %v604_v51 = vld [vmem:[%s4505_s3 + $0x2a0] sm:$0xff]  ;;  %v613_v58 = vld [vmem:[%s4505_s3 + $0x2e8] sm:$0xff] }
  0x38   : > { %3366 = vmatpush1.bf16.msra.mxu0 %v3365_v52  ;;  %3430 = vmatpush3.bf16.msra.mxu1 %v3429_v53  ;;  %v607_v52 = vld [vmem:[%s4505_s3 + $0x2b8] sm:$0xff]  ;;  %v1753_v14 = vld [vmem:[%s4507_s5] sm:$0xf]  ;;  %v4161_v40 = vld [vmem:[%s4506_s4 + $0x6] sm:$0x3] }
  0x39   : > { %3368 = vmatprep.subr.bf16.mxu0 %v3367_v56  ;;  %3432 = vmatprep.subr.bf16.mxu1 %v3431_v57  ;;  %v611_v53 = vld [vmem:[%s4505_s3 + $0x2d8] sm:$0xff]  ;;  %v3401_v55 = vpack.c.bf16 %v607_v52, %v604_v51  ;;  %v610_v57 = vld [vmem:[%s4505_s3 + $0x2d0] sm:$0xff]  ;;  %v3026_v23 = vld [vmem:[%s4506_s4 + $0x2] sm:$0x3] }
  0x3a   : > { %v3403_v56 = vpack.c.bf16 %v614_v54, %v611_v53  ;;  %v3405_v59 = vpack.c.bf16 %v613_v58, %v610_v57  ;;  %v794_v46 = vld [vmem:[%s4506_s4] sm:$0x3]  ;;  %v3044_v51 = vld [vmem:[%s4506_s4 + $0x8] sm:$0x3] }
  0x3c   : > { %3370 = vmatpush1.bf16.msra.mxu0 %v3369_v0  ;;  %3434 = vmatpush3.bf16.msra.mxu1 %v3433_v1 }
  0x3d   : > { %3372 = vmatprep.subr.bf16.mxu0 %v3371_v3  ;;  %3436 = vmatprep.subr.bf16.mxu1 %v3435_v5 }
  0x40   : > { %3374 = vmatpush1.bf16.msra.mxu0 %v3373_v11  ;;  %3438 = vmatpush3.bf16.msra.mxu1 %v3437_v12 }
  0x41   : > { %3376 = vmatprep.subr.bf16.mxu0 %v3375_v13 }
  0x43   : > { %755 = vmatmul.mubr.f32.vlgmr.msra.gmra.mrb[2].mxu1 %v3908_v38 }
  0x44   : > { %3378 = vmatpush1.bf16.msra.mxu0 %v3377_v18  ;;  %862 = vmatprep.mubr.bf16.mxu1 %v3576_v10 }
  0x45   : > { %3380 = vmatprep.subr.bf16.mxu0 %v3379_v19 }
  0x48   : > { %3382 = vmatpush1.bf16.msra.mxu0 %v3381_v24 }
  0x49   : > { %3384 = vmatprep.subr.bf16.mxu0 %v3383_v25 }
  0x4c   : > { %3386 = vmatpush1.bf16.msra.mxu0 %v3385_v30  ;;  %v4141_v30 = vld [vmem:[%s4506_s4 + $0x4] sm:$0x3] }
  0x4d   : > { %3388 = vmatprep.subr.bf16.mxu0 %v3387_v31 }
  0x50   : > { %3390 = vmatpush1.bf16.msra.mxu0 %v3389_v36 }
  0x51   : > { %3392 = vmatprep.subr.bf16.mxu0 %v3391_v37 }
  0x54   : > { %3394 = vmatpush1.bf16.msra.mxu0 %v3393_v43 }
  0x55   : > { %3396 = vmatprep.subr.bf16.mxu0 %v3395_v44 }
  0x58   : > { %3398 = vmatpush1.bf16.msra.mxu0 %v3397_v49 }
  0x59   : > { %3400 = vmatprep.subr.bf16.mxu0 %v3399_v50 }
  0x5c   : > { %3402 = vmatpush1.bf16.msra.mxu0 %v3401_v55 }
  0x5d   : > { %3404 = vmatprep.subr.bf16.mxu0 %v3403_v56 }
  0x60   : > { %3406 = vmatpush1.bf16.msra.mxu0 %v3405_v59 }
  0x63   : > { %684 = vmatmul.mubr.f32.vlgmr.msra.gmra.mrb[2].mxu0 %v3908_v38 }
  0x64   : > { %1059 = vmatprep.mubr.bf16.mxu0 %v3576_v10 }
  0xf6   : > { %v444_v60 = vpop.f32.mrb[0].mxu0  ;;  %v515_v61 = vpop.f32.mrb[0].mxu1 }
  0xf7   : > { %v446_v62 = vpop.f32.mrb[1].mxu0  ;;  %v3206_v63 = vpop.f32.mrb[1].mxu1  ;;  %v3048_v61 = vld [vmem:[%s4506_s4 + $0xa] sm:$0x3] }
  0xf8   : > { %v3106_v0 = vpack.c.bf16 %v446_v62, %v444_v60 }
  0xfa   : > { %v787_v1 = vrot.slane %v3106_v0, 6 }
  0xfc   : > { %791 = vst [vmem:[#allocation2] sm:$0xcc] %v787_v1 }
 0x116   : > { %v3149_v2 = vpop.f32.mrb[2].mxu1 }
 0x117   : > { %v3150_v3 = vpop.f32.mrb[3].mxu1 }
 0x118   : > { %v3151_v4 = vadd.f32 %v3150_v3, %v3149_v2 }
 0x11a   : > { %v3105_v5 = vpack.c.bf16 %v3151_v4, %v3151_v4 }
 0x11c   : > { %775 = vst.msk [vmem:[#allocation2 + $0x8] sm:$0x3] %vm774_vm2, %v3105_v5  ;;  %v3052_v5 = vld [vmem:[%s4506_s4 + $0xc] sm:$0x3]  ;;  %vm1819_vm2 = vmor %vm1818_vm1, %vm1817_vm15  ;;  %vm1852_vm15 = vcmask 31744  }
 0x123   : > { %v4070_v6 = vld [vmem:[#allocation2 + $0x8] ss:$0 sps:$4 sm:$0xff]  }
 0x124   : > { %811 = vrot.lane.b32.xlu1 %v4070_v6, %s3575_s21  ;;  %v921_v49 = vsel %vm820_vm4, %v4070_v6, 0 }
 0x136   : > { %v685_v38 = vpop.f32.mrb[2].mxu0 }
 0x137   : > { %v687_v7 = vpop.f32.mrb[3].mxu0 }
 0x138   : > { %v3104_v9 = vpack.c.bf16 %v687_v7, %v685_v38 }
 0x13a   : > { %773 = vst [vmem:[#allocation2] sm:$0x33] %v3104_v9 }
 0x141   : > { %v795_v11 = vld [vmem:[#allocation2] sm:$0xff] }
 0x142   : > { %v4078_v12 = vcombine.low %v795_v11, %v795_v11  ;;  %v3028_v13 = vcombine.high %v795_v11, %v795_v11 }
 0x144   : > { %1006 = vrot.lane.b32.xlu1 %v4078_v12, %s3577_s22  ;;  %807 = vrot.lane.b32.xlu0 %v4078_v12, %s3575_s21  ;;  %v915_v39 = vsel %vm820_vm4, %v4078_v12, 0 }
 0x148   : > { %1010 = vrot.lane.b32.xlu1 %v4070_v6, %s3577_s22  ;;  %809 = vrot.lane.b32.xlu0 %v3028_v13, %s3575_s21 }
 0x14c   : > { %1115 = vrot.lane.b32.xlu1 %v3028_v13, %s3578_s23  ;;  %1008 = vrot.lane.b32.xlu0 %v3028_v13, %s3577_s22 }
 0x150   : > { %1220 = vrot.lane.b32.xlu1 %v4078_v12, %s3579_s24  ;;  %1113 = vrot.lane.b32.xlu0 %v4078_v12, %s3578_s23 }
 0x154   : > { %1224 = vrot.lane.b32.xlu1 %v4070_v6, %s3579_s24  ;;  %1117 = vrot.lane.b32.xlu0 %v4070_v6, %s3578_s23 }
 0x158   : > { %1329 = vrot.lane.b32.xlu1 %v3028_v13, %s3580_s14  ;;  %1222 = vrot.lane.b32.xlu0 %v3028_v13, %s3579_s24 }
 0x15c   : > { %1434 = vrot.lane.b32.xlu1 %v4078_v12, %s3581_s25  ;;  %1327 = vrot.lane.b32.xlu0 %v4078_v12, %s3580_s14 }
 0x160   : > { %1438 = vrot.lane.b32.xlu1 %v4070_v6, %s3581_s25  ;;  %1331 = vrot.lane.b32.xlu0 %v4070_v6, %s3580_s14 }
 0x164   : > { %1543 = vrot.lane.b32.xlu1 %v3028_v13, %s3582_s26  ;;  %1436 = vrot.lane.b32.xlu0 %v3028_v13, %s3581_s25 }
 0x168   : > { %1648 = vrot.lane.b32.xlu1 %v4078_v12, %s3583_s18  ;;  %1541 = vrot.lane.b32.xlu0 %v4078_v12, %s3582_s26 }
 0x16c   : > { %1652 = vrot.lane.b32.xlu1 %v4070_v6, %s3583_s18  ;;  %1545 = vrot.lane.b32.xlu0 %v4070_v6, %s3582_s26 }
 0x170   : > { %1650 = vrot.lane.b32.xlu0 %v3028_v13, %s3583_s18 }
 0x174   : > { %1756 = vperm.xlu0 %3494, %v1753_v14  }
 0x196   : > { %v812_v15 = vpop.permute.xlu1 %811 }
 0x197   : > { %v828_v28 = vsel %vm820_vm4, %v812_v15, 0 }
 0x1b6   : > { %v1007_v16 = vpop.permute.xlu1 %1006  ;;  %v808_v17 = vpop.permute.xlu0 %807 }
 0x1ba   : > { %v4121_v18 = vpop.permute.xlu1 %1010  ;;  %v810_v19 = vpop.permute.xlu0 %809 }
 0x1bb   : > { %v814_v20 = vsel %vm813_vm3, %v808_v17, %v810_v19  ;;  %v815_v21 = vsel %vm813_vm3, %v810_v19, %v812_v15  ;;  %v1025_v59 = vsel %vm820_vm4, %v4121_v18, 0 }
 0x1bc   : > { %v822_v22 = vsel %vm820_vm4, %v814_v20, 0  ;;  %3030 = vmatprep.subr.msk.bf16.mxu1 %vm820_vm4, %v815_v21 }
 0x1bd   : > { %831 = vmatpush1.bf16.msra.mxu1 %v822_v22 }
 0x1be   : > { %v1116_v24 = vpop.permute.xlu1 %1115  ;;  %v1009_v25 = vpop.permute.xlu0 %1008  ;;  %3207 = vmatprep.subr.bf16.mxu1 %v3573_v8 }
 0x1bf   : > { %v1013_v26 = vsel %vm1012_vm5, %v1007_v16, %v1009_v25  ;;  %v1014_v27 = vsel %vm1012_vm5, %v1009_v25, %v4121_v18  ;;  %v3060_v16 = vld [vmem:[%s4506_s4 + $0x10] sm:$0x3] }
 0x1c0   : > { %v1019_v29 = vsel %vm820_vm4, %v1013_v26, 0  ;;  %3031 = vmatmul.mubr.msk.bf16.vlgmr.msra.gmra.mrb[4].mxu1 %vm816_vm6, %v3026_v23  ;;  %3037 = vmatprep.subr.msk.bf16.mxu0 %vm820_vm4, %v1014_v27 }
 0x1c1   : > { %3208 = vmatpush3.bf16.msra.mxu1 %v828_v28  ;;  %1028 = vmatpush1.bf16.msra.mxu0 %v1019_v29 }
 0x1c2   : > { %v1221_v31 = vpop.permute.xlu1 %1220  ;;  %3033 = vmatprep.subr.msk.bf16.mxu1 %vm820_vm4, %v3028_v13  ;;  %v1114_v32 = vpop.permute.xlu0 %1113  ;;  %3209 = vmatprep.mubr.msk.bf16.mxu1 %vm3574_vm0, %v3573_v8  ;;  %v3056_v13 = vld [vmem:[%s4506_s4 + $0xe] sm:$0x3] }
 0x1c3   : > { %v1120_v33 = vsel %vm1119_vm7, %v1114_v32, %v1116_v24 }
 0x1c4   : > { %3038 = vmatmul.mubr.msk.bf16.vlgmr.msra.gmra.mrb[4].mxu0 %vm816_vm6, %v4141_v30  ;;  %v1126_v37 = vsel %vm820_vm4, %v1120_v33, 0 }
 0x1c5   : > { %1166 = vmatprep.mubr.bf16.mxu0 %v3576_v10 }
 0x1c6   : > { %v4150_v34 = vpop.permute.xlu1 %1224  ;;  %v1118_v35 = vpop.permute.xlu0 %1117 }
 0x1c7   : > { %v1121_v36 = vsel %vm1119_vm7, %v1116_v24, %v1118_v35  ;;  %v1132_v3 = vsel %vm820_vm4, %v1118_v35, 0  ;;  %v1239_v11 = vsel %vm820_vm4, %v4150_v34, 0 }
 0x1c8   : > { %3210 = vmatmul.mubr.msk.bf16.vlgmr.msra.gmra.mrb[8].mxu1 %vm816_vm6, %v3026_v23  ;;  %3041 = vmatprep.subr.msk.bf16.mxu0 %vm820_vm4, %v1121_v36 }
 0x1c9   : > { %924 = vmatpush1.bf16.msra.mxu1 %v915_v39  ;;  %1135 = vmatpush1.bf16.msra.mxu0 %v1126_v37 }
 0x1ca   : > { %v1330_v41 = vpop.permute.xlu1 %1329  ;;  %v1223_v42 = vpop.permute.xlu0 %1222  ;;  %955 = vmatprep.mubr.bf16.mxu1 %v3576_v10  ;;  %3213 = vmatprep.subr.bf16.mxu1 %v3573_v8 }
 0x1cb   : > { %v1227_v43 = vsel %vm1226_vm8, %v1221_v31, %v1223_v42  ;;  %v1228_v44 = vsel %vm1226_vm8, %v1223_v42, %v4150_v34 }
 0x1cc   : > { %v1233_v45 = vsel %vm820_vm4, %v1227_v43, 0  ;;  %3042 = vmatmul.mubr.msk.bf16.vlgmr.msra.gmra.mrb[8].mxu0 %vm816_vm6, %v4161_v40  ;;  %3045 = vmatprep.subr.msk.bf16.mxu0 %vm820_vm4, %v1228_v44 }
 0x1cd   : > { %1242 = vmatpush1.bf16.msra.mxu0 %v1233_v45  ;;  %1273 = vmatprep.mubr.bf16.mxu0 %v3576_v10 }
 0x1ce   : > { %v1435_v47 = vpop.permute.xlu1 %1434  ;;  %v1328_v48 = vpop.permute.xlu0 %1327 }
 0x1cf   : > { %v1334_v50 = vsel %vm1333_vm9, %v1328_v48, %v1330_v41 }
 0x1d0   : > { %3034 = vmatmul.mubr.msk.bf16.vlgmr.msra.gmra.mrb[12].mxu1 %vm816_vm6, %v794_v46  ;;  %v1340_v55 = vsel %vm820_vm4, %v1334_v50, 0 }
 0x1d1   : > { %3214 = vmatpush3.bf16.msra.mxu1 %v921_v49  ;;  %3215 = vmatprep.mubr.msk.bf16.mxu1 %vm3574_vm0, %v3573_v8 }
 0x1d2   : > { %v4185_v52 = vpop.permute.xlu1 %1438  ;;  %v1332_v53 = vpop.permute.xlu0 %1331  ;;  %3219 = vmatprep.subr.bf16.mxu1 %v3573_v8 }
 0x1d3   : > { %v1335_v54 = vsel %vm1333_vm9, %v1330_v41, %v1332_v53  ;;  %v1346_v15 = vsel %vm820_vm4, %v1332_v53, 0  ;;  %v1453_v17 = vsel %vm820_vm4, %v4185_v52, 0 }
 0x1d4   : > { %3046 = vmatmul.mubr.msk.bf16.vlgmr.msra.gmra.mrb[12].mxu0 %vm816_vm6, %v3044_v51  ;;  %3049 = vmatprep.subr.msk.bf16.mxu0 %vm820_vm4, %v1335_v54 }
 0x1d5   : > { %1349 = vmatpush1.bf16.msra.mxu0 %v1340_v55  ;;  %1380 = vmatprep.mubr.bf16.mxu0 %v3576_v10 }
 0x1d6   : > { %v1544_v56 = vpop.permute.xlu1 %1543  ;;  %v1437_v57 = vpop.permute.xlu0 %1436 }
 0x1d7   : > { %v1442_v58 = vsel %vm1440_vm10, %v1437_v57, %v4185_v52  ;;  %v1441_v60 = vsel %vm1440_vm10, %v1435_v47, %v1437_v57 }
 0x1d8   : > { %3216 = vmatmul.mubr.msk.bf16.vlgmr.msra.gmra.mrb[16].mxu1 %vm816_vm6, %v794_v46  ;;  %3053 = vmatprep.subr.msk.bf16.mxu0 %vm820_vm4, %v1442_v58  ;;  %v1447_v63 = vsel %vm820_vm4, %v1441_v60, 0 }
 0x1d9   : > { %3220 = vmatpush3.bf16.msra.mxu1 %v1025_v59  ;;  %3221 = vmatprep.mubr.msk.bf16.mxu1 %vm3574_vm0, %v3573_v8 }
 0x1da   : > { %v1542_v62 = vpop.permute.xlu0 %1541  ;;  %3225 = vmatprep.subr.bf16.mxu1 %v3573_v8  ;;  %v1649_v0 = vpop.permute.xlu1 %1648 }
 0x1db   : > { %v1548_v4 = vsel %vm1547_vm11, %v1542_v62, %v1544_v56 }
 0x1dc   : > { %3050 = vmatmul.mubr.msk.bf16.vlgmr.msra.gmra.mrb[16].mxu0 %vm816_vm6, %v3048_v61  ;;  %v1554_v9 = vsel %vm820_vm4, %v1548_v4, 0 }
 0x1dd   : > { %1456 = vmatpush1.bf16.msra.mxu0 %v1447_v63  ;;  %1487 = vmatprep.mubr.bf16.mxu0 %v3576_v10 }
 0x1de   : > { %v1546_v1 = vpop.permute.xlu0 %1545  ;;  %v1653_v6 = vpop.permute.xlu1 %1652 }
 0x1df   : > { %v1549_v2 = vsel %vm1547_vm11, %v1544_v56, %v1546_v1  ;;  %v1560_v18 = vsel %vm820_vm4, %v1546_v1, 0  ;;  %v1667_v19 = vsel %vm820_vm4, %v1653_v6, 0 }
 0x1e0   : > { %3222 = vmatmul.mubr.msk.bf16.vlgmr.msra.gmra.mrb[20].mxu1 %vm816_vm6, %v4141_v30  ;;  %3057 = vmatprep.subr.msk.bf16.mxu0 %vm820_vm4, %v1549_v2 }
 0x1e1   : > { %3226 = vmatpush3.bf16.msra.mxu1 %v1132_v3  ;;  %3227 = vmatprep.mubr.msk.bf16.mxu1 %vm3574_vm0, %v3573_v8 }
 0x1e2   : > { %v1651_v38 = vpop.permute.xlu0 %1650  ;;  %3231 = vmatprep.subr.bf16.mxu1 %v3573_v8 }
 0x1e3   : > { %v1656_v7 = vsel %vm1654_vm12, %v1651_v38, %v1653_v6  ;;  %v1655_v12 = vsel %vm1654_vm12, %v1649_v0, %v1651_v38 }
 0x1e4   : > { %3054 = vmatmul.mubr.msk.bf16.vlgmr.msra.gmra.mrb[20].mxu0 %vm816_vm6, %v3052_v5  ;;  %v1661_v14 = vsel %vm820_vm4, %v1655_v12, 0 }
 0x1e5   : > { %1563 = vmatpush1.bf16.msra.mxu0 %v1554_v9  ;;  %1594 = vmatprep.mubr.bf16.mxu0 %v3576_v10 }
 0x1e6   : > { %3061 = vmatprep.subr.msk.bf16.mxu0 %vm820_vm4, %v1656_v7  ;;  %vm1820_vm4 = vcmask 414724  }
 0x1e7   : > { %vm1821_vm13 = vmor %vm1820_vm4, %vm1819_vm2 }
 0x1e8   : > { %3228 = vmatmul.mubr.msk.bf16.vlgmr.msra.gmra.mrb[24].mxu1 %vm816_vm6, %v4161_v40 }
 0x1e9   : > { %3232 = vmatpush3.bf16.msra.mxu1 %v1239_v11  ;;  %3233 = vmatprep.mubr.msk.bf16.mxu1 %vm3574_vm0, %v3573_v8 }
 0x1ea   : > { %3237 = vmatprep.subr.bf16.mxu1 %v3573_v8 }
 0x1ec   : > { %3058 = vmatmul.mubr.msk.bf16.vlgmr.msra.gmra.mrb[24].mxu0 %vm816_vm6, %v3056_v13 }
 0x1ed   : > { %1670 = vmatpush1.bf16.msra.mxu0 %v1661_v14  ;;  %1701 = vmatprep.mubr.bf16.mxu0 %v3576_v10 }
 0x1f0   : > { %3234 = vmatmul.mubr.msk.bf16.vlgmr.msra.gmra.mrb[28].mxu1 %vm816_vm6, %v3044_v51 }
 0x1f1   : > { %3238 = vmatpush3.bf16.msra.mxu1 %v1346_v15  ;;  %3239 = vmatprep.mubr.msk.bf16.mxu1 %vm3574_vm0, %v3573_v8 }
 0x1f2   : > { %3243 = vmatprep.subr.bf16.mxu1 %v3573_v8 }
 0x1f4   : > { %3062 = vmatmul.mubr.msk.bf16.vlgmr.msra.gmra.mrb[28].mxu0 %vm816_vm6, %v3060_v16 }
 0x1f5   : > { %1898 = vmatprep.mubr.bf16.mxu0 %v3576_v10 }
 0x1f8   : > { %3240 = vmatmul.mubr.msk.bf16.vlgmr.msra.gmra.mrb[32].mxu1 %vm816_vm6, %v3048_v61 }
 0x1f9   : > { %3244 = vmatpush3.bf16.msra.mxu1 %v1453_v17  ;;  %3245 = vmatprep.mubr.msk.bf16.mxu1 %vm3574_vm0, %v3573_v8  ;;  %v1767_v17 = vlaneseq }
 0x1fa   : > { %3249 = vmatprep.subr.bf16.mxu1 %v3573_v8 }
 0x200   : > { %3246 = vmatmul.mubr.msk.bf16.vlgmr.msra.gmra.mrb[36].mxu1 %vm816_vm6, %v3052_v5 }
 0x201   : > { %3250 = vmatpush3.bf16.msra.mxu1 %v1560_v18  ;;  %3251 = vmatprep.mubr.msk.bf16.mxu1 %vm3574_vm0, %v3573_v8 }
 0x202   : > { %3255 = vmatprep.subr.bf16.mxu1 %v3573_v8 }
 0x208   : > { %3252 = vmatmul.mubr.msk.bf16.vlgmr.msra.gmra.mrb[40].mxu1 %vm816_vm6, %v3056_v13 }
 0x209   : > { %3256 = vmatpush3.bf16.msra.mxu1 %v1667_v19  ;;  %3257 = vmatprep.mubr.msk.bf16.mxu1 %vm3574_vm0, %v3573_v8 }
 0x20a   : > { %3261 = vmatprep.subr.bf16.mxu1 %v3573_v8 }
 0x210   : > { %3258 = vmatmul.mubr.msk.bf16.vlgmr.msra.gmra.mrb[44].mxu1 %vm816_vm6, %v3060_v16  ;;  %vm1814_vm6 = vcmask 154624  }
 0x211   : > { %3263 = vmatprep.mubr.msk.bf16.mxu1 %vm3574_vm0, %v3573_v8 }
 0x293   : > { %v864_v20 = vpop.f32.mrb[4].mxu1 }
 0x294   : > { %v866_v21 = vpop.f32.mrb[5].mxu1 }
 0x295   : > { %v868_v22 = vpop.f32.mrb[6].mxu1 }
 0x296   : > { %v869_v23 = vpop.f32.mrb[7].mxu1 }
 0x297   : > { %v1061_v24 = vpop.f32.mrb[4].mxu0 }
 0x298   : > { %v1063_v25 = vpop.f32.mrb[5].mxu0 }
 0x299   : > { %v1065_v26 = vpop.f32.mrb[6].mxu0 }
 0x29a   : > { %v1066_v27 = vpop.f32.mrb[7].mxu0 }
 0x29b   : > { %v905_v28 = vpop.f32.mrb[8].mxu1 }
 0x29c   : > { %v3211_v29 = vpop.f32.mrb[9].mxu1 }
 0x29d   : > { %v908_v30 = vpop.f32.mrb[10].mxu1 }
 0x29e   : > { %v3212_v31 = vpop.f32.mrb[11].mxu1 }
 0x29f   : > { %v1168_v32 = vpop.f32.mrb[8].mxu0 }
 0x2a0   : > { %v1170_v33 = vpop.f32.mrb[9].mxu0 }
 0x2a1   : > { %v1172_v34 = vpop.f32.mrb[10].mxu0 }
 0x2a2   : > { %v1173_v35 = vpop.f32.mrb[11].mxu0  ;;  %v1757_v34 = vpop.permute.xlu0 %1756 }
 0x2a3   : > { %v957_v36 = vpop.f32.mrb[12].mxu1 }
 0x2a4   : > { %v958_v37 = vadd.f32 %v957_v36, %v864_v20  ;;  %v959_v39 = vpop.f32.mrb[13].mxu1 }
 0x2a5   : > { %v960_v40 = vadd.f32 %v959_v39, %v866_v21  ;;  %v961_v41 = vpop.f32.mrb[14].mxu1 }
 0x2a6   : > { %v1108_v42 = vadd.f32 %v1061_v24, %v958_v37  ;;  %v962_v43 = vpop.f32.mrb[15].mxu1  ;;  %v1768_v24 = vshrl.u32 %v1767_v17, 7 }
 0x2a7   : > { %v1109_v44 = vadd.f32 %v1063_v25, %v960_v40  ;;  %v1275_v45 = vpop.f32.mrb[12].mxu0 }
 0x2a8   : > { %v1215_v46 = vadd.f32 %v1168_v32, %v1108_v42  ;;  %v1277_v47 = vpop.f32.mrb[13].mxu0  ;;  %v1769_v30 = vsub.s32 0, %v1768_v24  ;;  %v1765_v32 = vld [vmem:[%s4510_s8] sm:$0x7] }
 0x2a9   : > { %v1216_v48 = vadd.f32 %v1170_v33, %v1109_v44  ;;  %v1279_v49 = vpop.f32.mrb[14].mxu0  ;;  %v1773_v33 = vsub.s32 1, %v1768_v24 }
 0x2aa   : > { %v1322_v50 = vadd.f32 %v1275_v45, %v1215_v46  ;;  %v1280_v51 = vpop.f32.mrb[15].mxu0  ;;  %v1770_v40 = vrot.slane %v1765_v32, %v1769_v30 }
 0x2ab   : > { %v1323_v52 = vadd.f32 %v1277_v47, %v1216_v48  ;;  %v998_v53 = vpop.f32.mrb[16].mxu1  ;;  %v1774_v43 = vrot.slane %v1765_v32, %v1773_v33 }
 0x2ac   : > { %v999_v54 = vadd.f32 %v998_v53, %v905_v28  ;;  %v3217_v55 = vpop.f32.mrb[17].mxu1 }
 0x2ad   : > { %v1001_v56 = vpop.f32.mrb[18].mxu1 }
 0x2ae   : > { %v3218_v57 = vpop.f32.mrb[19].mxu1 }
 0x2af   : > { %v1382_v58 = vpop.f32.mrb[16].mxu0 }
 0x2b0   : > { %v1429_v59 = vadd.f32 %v1382_v58, %v1322_v50  ;;  %v1384_v60 = vpop.f32.mrb[17].mxu0 }
 0x2b1   : > { %v1430_v61 = vadd.f32 %v1384_v60, %v1323_v52  ;;  %v1386_v62 = vpop.f32.mrb[18].mxu0 }
 0x2b2   : > { %v1387_v63 = vpop.f32.mrb[19].mxu0 }
 0x2b3   : > { %v1102_v0 = vpop.f32.mrb[20].mxu1 }
 0x2b4   : > { %v1110_v1 = vadd.f32 %v1102_v0, %v999_v54  ;;  %v3223_v2 = vpop.f32.mrb[21].mxu1 }
 0x2b5   : > { %v1105_v3 = vpop.f32.mrb[22].mxu1 }
 0x2b6   : > { %v3224_v4 = vpop.f32.mrb[23].mxu1  ;;  %v1777_v3 = vsub.s32 2, %v1768_v24 }
 0x2b7   : > { %v1489_v5 = vpop.f32.mrb[20].mxu0 }
 0x2b8   : > { %v1536_v6 = vadd.f32 %v1489_v5, %v1429_v59  ;;  %v1491_v38 = vpop.f32.mrb[21].mxu0 }
 0x2b9   : > { %v1537_v7 = vadd.f32 %v1491_v38, %v1430_v61  ;;  %v1493_v9 = vpop.f32.mrb[22].mxu0 }
 0x2ba   : > { %v1494_v11 = vpop.f32.mrb[23].mxu0 }
 0x2bb   : > { %v1209_v12 = vpop.f32.mrb[24].mxu1  ;;  %v1778_v11 = vrot.slane %v1765_v32, %v1777_v3 }
 0x2bc   : > { %v1217_v13 = vadd.f32 %v1209_v12, %v1110_v1  ;;  %v3229_v14 = vpop.f32.mrb[25].mxu1  ;;  %v3584_v1 = vmov 1983009808  }
 0x2bd   : > { %v1212_v15 = vpop.f32.mrb[26].mxu1  ;;  %v1797_v2 = vunpack.c.l.s4 %v3584_v1 }
 0x2be   : > { %v3230_v16 = vpop.f32.mrb[27].mxu1 }
 0x2bf   : > { %v1596_v18 = vpop.f32.mrb[24].mxu0 }
 0x2c0   : > { %v1643_v19 = vadd.f32 %v1596_v18, %v1536_v6  ;;  %v1598_v20 = vpop.f32.mrb[25].mxu0 }
 0x2c1   : > { %v1644_v21 = vadd.f32 %v1598_v20, %v1537_v7  ;;  %v1600_v22 = vpop.f32.mrb[26].mxu0  ;;  %v1798_v7 = vunpack.c.0.s8 %v1797_v2 }
 0x2c2   : > { %v1601_v23 = vpop.f32.mrb[27].mxu0 }
 0x2c3   : > { %v1316_v25 = vpop.f32.mrb[28].mxu1  ;;  %v4274_v14 = vsub.s32 %v1798_v7, %v1768_v24 }
 0x2c4   : > { %v1324_v26 = vadd.f32 %v1316_v25, %v1217_v13  ;;  %v3235_v27 = vpop.f32.mrb[29].mxu1 }
 0x2c5   : > { %v1319_v28 = vpop.f32.mrb[30].mxu1 }
 0x2c6   : > { %v3236_v29 = vpop.f32.mrb[31].mxu1 }
 0x2c7   : > { %v1703_v31 = vpop.f32.mrb[28].mxu0 }
 0x2c8   : > { %v1750_v35 = vadd.f32 %v1703_v31, %v1643_v19  ;;  %v1705_v36 = vpop.f32.mrb[29].mxu0 }
 0x2c9   : > { %v1751_v37 = vadd.f32 %v1705_v36, %v1644_v21  ;;  %v1707_v39 = vpop.f32.mrb[30].mxu0 }
 0x2ca   : > { %v1759_v41 = vadd.f32 %v1757_v34, %v1750_v35  ;;  %v1708_v42 = vpop.f32.mrb[31].mxu0 }
 0x2cb   : > { %v1760_v44 = vadd.f32 %v1757_v34, %v1751_v37  ;;  %v1423_v45 = vpop.f32.mrb[32].mxu1 }
 0x2cc   : > { %v1762_v46 = vmax.f32 %v1759_v41, 0.0  ;;  %v1431_v47 = vadd.f32 %v1423_v45, %v1324_v26  ;;  %v3241_v48 = vpop.f32.mrb[33].mxu1 }
 0x2cd   : > { %v1763_v49 = vmax.f32 %v1760_v44, 0.0  ;;  %v1426_v50 = vpop.f32.mrb[34].mxu1 }
 0x2ce   : > { %v1782_v51 = vmul.f32 %v1770_v40, %v1762_v46  ;;  %v3242_v52 = vpop.f32.mrb[35].mxu1 }
 0x2cf   : > { %v1783_v53 = vmul.f32 %v1774_v43, %v1763_v49 }
 0x2d1   : > { %v3064_v54 = vpack.c.bf16 %v1783_v53, %v1782_v51 }
 0x2d3   : > { %v1530_v55 = vpop.f32.mrb[36].mxu1  ;;  %v1802_v17 = vrot.slane %v3064_v54, %v4274_v14 }
 0x2d4   : > { %v1538_v56 = vadd.f32 %v1530_v55, %v1431_v47  ;;  %v3247_v57 = vpop.f32.mrb[37].mxu1 }
 0x2d5   : > { %v1533_v58 = vpop.f32.mrb[38].mxu1 }
 0x2d6   : > { %v3248_v59 = vpop.f32.mrb[39].mxu1 }
 0x2db   : > { %v1637_v60 = vpop.f32.mrb[40].mxu1 }
 0x2dc   : > { %v1645_v61 = vadd.f32 %v1637_v60, %v1538_v56  ;;  %v3253_v62 = vpop.f32.mrb[41].mxu1 }
 0x2dd   : > { %v1640_v63 = vpop.f32.mrb[42].mxu1 }
 0x2de   : > { %v3254_v0 = vpop.f32.mrb[43].mxu1 }
 0x2df   : > { %v2908_v0 = vld [vmem:[%s4509_s7] sm:$0xf] }
 0x2e3   : > { %v1744_v4 = vpop.f32.mrb[44].mxu1 }
 0x2e4   : > { %v1752_v5 = vadd.f32 %v1744_v4, %v1645_v61  ;;  %v3259_v6 = vpop.f32.mrb[45].mxu1 }
 0x2e5   : > { %v1747_v38 = vpop.f32.mrb[46].mxu1 }
 0x2e6   : > { %v1761_v9 = vadd.f32 %v1757_v34, %v1752_v5  ;;  %v3260_v12 = vpop.f32.mrb[47].mxu1 }
 0x2e8   : > { %v1764_v13 = vmax.f32 %v1761_v9, 0.0  ;;  %v3065_v9 = vld [vmem:[%s4508_s6 + $0x2] sm:$0x3] }
 0x2ea   : > { %v1784_v15 = vmul.f32 %v1778_v11, %v1764_v13 }
 0x2ec   : > { %v1791_v16 = vpack.c.bf16 %v1784_v15, %v1784_v15 }
 0x2ee   : > { %v1809_v18 = vrot.slane %v1791_v16, %v4274_v14 }
 0x2f0   : > { %v1810_v19 = vcombine.low %v1802_v17, %v1809_v18  ;;  %v1823_v18 = vld [vmem:[%s4508_s6] sm:$0x3] }
 0x2f2   : > { %1811 = vrot.lane.b32.xlu1 %v1810_v19, %s3585_s29  ;;  %s4460_s29 = scalar_lea.hbm %s4511_s9, %s3440_s17 }
 0x364   : > { %v1812_v20 = vpop.permute.xlu1 %1811 }
 0x365   : > { %v1813_v21 = vrot.slane %v1812_v20, 6 }
 0x367   : > { %v1815_v22 = vsel %vm1814_vm6, %v1813_v21, %v1812_v20 }
 0x368   : > { %1822 = vst.msk [vmem:[#allocation3] sm:$0x3f] %vm1821_vm13, %v1815_v22 }
 0x36f   : > { %v1824_v23 = vld [vmem:[#allocation3] sm:$0x3f] }
 0x370   : > { %v4279_v24 = vrot.slane %v1824_v23, %v4274_v14  ;;  %v1828_v25 = vcombine.high %v1824_v23, %v1824_v23  ;;  %v2042_v26 = vld [vmem:[#allocation3] sm:$0x3f] }
 0x371   : > { %v2051_v29 = vrot.slane %v2042_v26, %v4274_v14  ;;  %v2044_v30 = vcombine.high %v2042_v26, %v2042_v26  ;;  %v2166_v31 = vld [vmem:[#allocation3] sm:$0x3f] }
 0x372   : > { %1844 = vrot.lane.b32.xlu1 %v4279_v24, %s3575_s21  ;;  %v4285_v27 = vcombine.high %v4279_v24, %v4279_v24  ;;  %v4290_v28 = vrot.slane %v1828_v25, %v4274_v14  ;;  %v2175_v34 = vrot.slane %v2166_v31, %v4274_v14  ;;  %v2168_v35 = vcombine.high %v2166_v31, %v2166_v31  ;;  %v2290_v36 = vld [vmem:[#allocation3] sm:$0x3f] }
 0x373   : > { %v2059_v32 = vcombine.high %v2051_v29, %v2051_v29  ;;  %v2058_v33 = vrot.slane %v2044_v30, %v4274_v14  ;;  %v2299_v40 = vrot.slane %v2290_v36, %v4274_v14  ;;  %v2292_v41 = vcombine.high %v2290_v36, %v2290_v36  ;;  %v2414_v42 = vld [vmem:[#allocation3] sm:$0x3f] }
 0x374   : > { %1846 = vrot.lane.b32.xlu0 %v4285_v27, %s3575_s21  ;;  %v2183_v37 = vcombine.high %v2175_v34, %v2175_v34  ;;  %v2182_v39 = vrot.slane %v2168_v35, %v4274_v14  ;;  %v2423_v45 = vrot.slane %v2414_v42, %v4274_v14  ;;  %v2416_v46 = vcombine.high %v2414_v42, %v2414_v42  ;;  %v2538_v47 = vld [vmem:[#allocation3] sm:$0x3f]  ;;  %v3076_v35 = vld [vmem:[%s4508_s6 + $0x6] sm:$0x3] }
 0x375   : > { %v2307_v43 = vcombine.high %v2299_v40, %v2299_v40  ;;  %v2306_v44 = vrot.slane %v2292_v41, %v4274_v14  ;;  %v2547_v50 = vrot.slane %v2538_v47, %v4274_v14  ;;  %v2540_v51 = vcombine.high %v2538_v47, %v2538_v47  ;;  %v2662_v52 = vld [vmem:[#allocation3] sm:$0x3f] }
 0x376   : > { %1848 = vrot.lane.b32.xlu1 %v4290_v28, %s3575_s21  ;;  %v2431_v48 = vcombine.high %v2423_v45, %v2423_v45  ;;  %v2430_v49 = vrot.slane %v2416_v46, %v4274_v14  ;;  %v2671_v55 = vrot.slane %v2662_v52, %v4274_v14  ;;  %v2664_v56 = vcombine.high %v2662_v52, %v2662_v52  ;;  %v2786_v57 = vld [vmem:[#allocation3] sm:$0x3f] }
 0x377   : > { %v2555_v53 = vcombine.high %v2547_v50, %v2547_v50  ;;  %v2554_v54 = vrot.slane %v2540_v51, %v4274_v14  ;;  %v2795_v60 = vrot.slane %v2786_v57, %v4274_v14  ;;  %v2788_v61 = vcombine.high %v2786_v57, %v2786_v57  ;;  %v3084_v51 = vld [vmem:[%s4508_s6 + $0xa] sm:$0x3] }
 0x378   : > { %2060 = vrot.lane.b32.xlu0 %v2051_v29, %s3577_s22  ;;  %v2679_v58 = vcombine.high %v2671_v55, %v2671_v55  ;;  %v2678_v59 = vrot.slane %v2664_v56, %v4274_v14  ;;  %v1957_v12 = vsel %vm1856_vm14, %v4290_v28, 0 }
 0x379   : > { %v2803_v62 = vcombine.high %v2795_v60, %v2795_v60  ;;  %v2802_v63 = vrot.slane %v2788_v61, %v4274_v14  ;;  %v1951_v14 = vsel %vm1856_vm14, %v4279_v24, 0 }
 0x37a   : > { %2062 = vrot.lane.b32.xlu1 %v2059_v32, %s3577_s22 }
 0x37c   : > { %2064 = vrot.lane.b32.xlu0 %v2058_v33, %s3577_s22 }
 0x37e   : > { %2184 = vrot.lane.b32.xlu1 %v2175_v34, %s3578_s23 }
 0x380   : > { %2186 = vrot.lane.b32.xlu0 %v2183_v37, %s3578_s23 }
 0x382   : > { %2188 = vrot.lane.b32.xlu1 %v2182_v39, %s3578_s23  ;;  %s3512_s23 = sshll.u32 %s3586_s13, 4  ;;  %s3513_s23 = int_to_ptr.vmem [resolvable:$false] %s3512_s23 }
 0x384   : > { %2308 = vrot.lane.b32.xlu0 %v2299_v40, %s3579_s24 }
 0x386   : > { %2310 = vrot.lane.b32.xlu1 %v2307_v43, %s3579_s24 }
 0x388   : > { %2312 = vrot.lane.b32.xlu0 %v2306_v44, %s3579_s24  ;;  %v3080_v44 = vld [vmem:[%s4508_s6 + $0x8] sm:$0x3]  ;;  %s3514_s24 = scalar_lea.vmem %s3513_s23, 384 }
 0x38a   : > { %2432 = vrot.lane.b32.xlu1 %v2423_v45, %s3580_s14 }
 0x38c   : > { %2434 = vrot.lane.b32.xlu0 %v2431_v48, %s3580_s14 }
 0x38e   : > { %2436 = vrot.lane.b32.xlu1 %v2430_v49, %s3580_s14 }
 0x390   : > { %2556 = vrot.lane.b32.xlu0 %v2547_v50, %s3581_s25 }
 0x392   : > { %2558 = vrot.lane.b32.xlu1 %v2555_v53, %s3581_s25 }
 0x394   : > { %2560 = vrot.lane.b32.xlu0 %v2554_v54, %s3581_s25 }
 0x396   : > { %2680 = vrot.lane.b32.xlu1 %v2671_v55, %s3582_s26 }
 0x398   : > { %2682 = vrot.lane.b32.xlu0 %v2679_v58, %s3582_s26  ;;  %v3088_v58 = vld [vmem:[%s4508_s6 + $0xc] sm:$0x3] }
 0x39a   : > { %2684 = vrot.lane.b32.xlu1 %v2678_v59, %s3582_s26  ;;  %s336_s26 = sand.u32 1, %s3562_s10  }
 0x39b   : > { %s2928_s21 = scalar_lea.sflag [#allocation5], %s336_s26 }
 0x39c   : > { %2804 = vrot.lane.b32.xlu0 %v2795_v60, %s3583_s18 }
 0x39e   : > { %2806 = vrot.lane.b32.xlu1 %v2803_v62, %s3583_s18 }
 0x3a0   : > { %2808 = vrot.lane.b32.xlu0 %v2802_v63, %s3583_s18  ;;  %s3439_s18 = smul.u32 12, %s336_s26 }
 0x3a2   : > { %2911 = vperm.xlu1 %3495, %v2908_v0   ;;  %s338_s28 = scalar_lea.vmem [#allocation4], %s3439_s18 }
 0x3a3   : > { %s2942_s0 = sshll.u32 %s338_s28, 4  ;;  %s4462_s0 = int_to_ptr.vmem [resolvable:$true] %s2942_s0 }
 0x3a4   : > { %s3508_s22 = scalar_lea.vmem %s4462_s0, 192  ;;  %p3515_p0 = scmp.lt.s32.totalorder %s4462_s0, %s3513_s23 }
 0x3a5   : > { %p3509_p11 = scmp.ne.s32.totalorder %s4462_s0, %s3508_s22  ;;  %p3516_p1 = scmp.lt.s32.totalorder %s3514_s24, %s3508_s22 }
 0x3a7   : > { %p3510_p12 = pnand %p3509_p11, %p3675_p5  ;;  %p3517_p2 = por %p3516_p1, %p3515_p0 }
 0x3a9   : > { %p3511_p13 = pneg %p3510_p12 }
 0x3ab   : > { %p3518_p3 = pnand %p3517_p2, %p3511_p13 }
 0x3e4   : > { %v1845_v1 = vpop.permute.xlu1 %1844 }
 0x3e6   : > { %v1847_v2 = vpop.permute.xlu0 %1846 }
 0x3e7   : > { %v1850_v3 = vsel %vm813_vm3, %v1845_v1, %v1847_v2  ;;  %v3092_v1 = vld [vmem:[%s4508_s6 + $0xe] sm:$0x3] }
 0x3e8   : > { %v1849_v4 = vpop.permute.xlu1 %1848  ;;  %v1858_v38 = vsel %vm1856_vm14, %v1850_v3, 0 }
 0x3e9   : > { %v1851_v5 = vsel %vm813_vm3, %v1847_v2, %v1849_v4  ;;  %v1864_v6 = vsel %vm1856_vm14, %v1849_v4, 0 }
 0x3ea   : > { %v2061_v7 = vpop.permute.xlu0 %2060  ;;  %3066 = vmatprep.subr.msk.bf16.mxu0 %vm1856_vm14, %v1851_v5  ;;  %3262 = vmatpush3.bf16.msra.mxu1 %v1864_v6  ;;  %v3096_v5 = vld [vmem:[%s4508_s6 + $0x10] sm:$0x3] }
 0x3eb   : > { %1867 = vmatpush1.bf16.msra.mxu0 %v1858_v38  ;;  %3267 = vmatprep.subr.bf16.mxu1 %v3573_v8 }
 0x3ec   : > { %3069 = vmatprep.subr.msk.bf16.mxu0 %vm1856_vm14, %v4285_v27  ;;  %v2063_v11 = vpop.permute.xlu1 %2062  ;;  %v3072_v27 = vld [vmem:[%s4508_s6 + $0x4] sm:$0x3] }
 0x3ed   : > { %3264 = vmatmul.mubr.msk.bf16.vlgmr.msra.gmra.mrb[48].mxu1 %vm1852_vm15, %v3065_v9  ;;  %v2066_v19 = vsel %vm1012_vm5, %v2061_v7, %v2063_v11 }
 0x3ee   : > { %v2065_v13 = vpop.permute.xlu0 %2064  ;;  %3067 = vmatmul.mubr.msk.bf16.vlgmr.msra.gmra.mrb[32].mxu0 %vm1852_vm15, %v3065_v9  ;;  %3268 = vmatpush3.bf16.msra.mxu1 %v1957_v12  ;;  %v2072_v23 = vsel %vm1856_vm14, %v2066_v19, 0 }
 0x3ef   : > { %v2067_v15 = vsel %vm1012_vm5, %v2063_v11, %v2065_v13  ;;  %1960 = vmatpush1.bf16.msra.mxu0 %v1951_v14  ;;  %3269 = vmatprep.mubr.msk.bf16.mxu1 %vm3574_vm0, %v3573_v8  ;;  %v2078_v21 = vsel %vm1856_vm14, %v2065_v13, 0 }
 0x3f0   : > { %3073 = vmatprep.subr.msk.bf16.mxu0 %vm1856_vm14, %v2067_v15  ;;  %v2185_v16 = vpop.permute.xlu1 %2184  ;;  %3273 = vmatprep.subr.bf16.mxu1 %v3573_v8 }
 0x3f1   : > { %1991 = vmatprep.mubr.bf16.mxu0 %v3576_v10 }
 0x3f2   : > { %v2187_v17 = vpop.permute.xlu0 %2186 }
 0x3f3   : > { %v2190_v28 = vsel %vm1119_vm7, %v2185_v16, %v2187_v17 }
 0x3f4   : > { %v2189_v20 = vpop.permute.xlu1 %2188  ;;  %v2196_v31 = vsel %vm1856_vm14, %v2190_v28, 0 }
 0x3f5   : > { %v2191_v22 = vsel %vm1119_vm7, %v2187_v17, %v2189_v20  ;;  %3270 = vmatmul.mubr.msk.bf16.vlgmr.msra.gmra.mrb[52].mxu1 %vm1852_vm15, %v1823_v18  ;;  %v2202_v30 = vsel %vm1856_vm14, %v2189_v20, 0 }
 0x3f6   : > { %3274 = vmatpush3.bf16.msra.mxu1 %v2078_v21  ;;  %v2309_v24 = vpop.permute.xlu0 %2308  ;;  %3070 = vmatmul.mubr.msk.bf16.vlgmr.msra.gmra.mrb[36].mxu0 %vm1852_vm15, %v1823_v18 }
 0x3f7   : > { %2081 = vmatpush1.bf16.msra.mxu0 %v2072_v23  ;;  %3275 = vmatprep.mubr.msk.bf16.mxu1 %vm3574_vm0, %v3573_v8 }
 0x3f8   : > { %3077 = vmatprep.subr.msk.bf16.mxu0 %vm1856_vm14, %v2191_v22  ;;  %v2311_v25 = vpop.permute.xlu1 %2310  ;;  %3279 = vmatprep.subr.bf16.mxu1 %v3573_v8 }
 0x3f9   : > { %2112 = vmatprep.mubr.bf16.mxu0 %v3576_v10  ;;  %v2314_v36 = vsel %vm1226_vm8, %v2309_v24, %v2311_v25 }
 0x3fa   : > { %v2313_v26 = vpop.permute.xlu0 %2312  ;;  %v2320_v40 = vsel %vm1856_vm14, %v2314_v36, 0 }
 0x3fb   : > { %v2315_v33 = vsel %vm1226_vm8, %v2311_v25, %v2313_v26  ;;  %v2326_v39 = vsel %vm1856_vm14, %v2313_v26, 0 }
 0x3fc   : > { %v2433_v29 = vpop.permute.xlu1 %2432 }
 0x3fd   : > { %3276 = vmatmul.mubr.msk.bf16.vlgmr.msra.gmra.mrb[56].mxu1 %vm1852_vm15, %v3072_v27 }
 0x3fe   : > { %3280 = vmatpush3.bf16.msra.mxu1 %v2202_v30  ;;  %v2435_v32 = vpop.permute.xlu0 %2434  ;;  %3074 = vmatmul.mubr.msk.bf16.vlgmr.msra.gmra.mrb[40].mxu0 %vm1852_vm15, %v3072_v27 }
 0x3ff   : > { %2205 = vmatpush1.bf16.msra.mxu0 %v2196_v31  ;;  %3281 = vmatprep.mubr.msk.bf16.mxu1 %vm3574_vm0, %v3573_v8  ;;  %v2438_v45 = vsel %vm1333_vm9, %v2433_v29, %v2435_v32 }
 0x400   : > { %3081 = vmatprep.subr.msk.bf16.mxu0 %vm1856_vm14, %v2315_v33  ;;  %3285 = vmatprep.subr.bf16.mxu1 %v3573_v8  ;;  %v2437_v34 = vpop.permute.xlu1 %2436  ;;  %v2444_v47 = vsel %vm1856_vm14, %v2438_v45, 0 }
 0x401   : > { %2236 = vmatprep.mubr.bf16.mxu0 %v3576_v10  ;;  %v2439_v41 = vsel %vm1333_vm9, %v2435_v32, %v2437_v34  ;;  %v2450_v46 = vsel %vm1856_vm14, %v2437_v34, 0 }
 0x402   : > { %v2557_v37 = vpop.permute.xlu0 %2556 }
 0x404   : > { %v2559_v42 = vpop.permute.xlu1 %2558 }
 0x405   : > { %3282 = vmatmul.mubr.msk.bf16.vlgmr.msra.gmra.mrb[60].mxu1 %vm1852_vm15, %v3076_v35  ;;  %v2562_v52 = vsel %vm1440_vm10, %v2557_v37, %v2559_v42 }
 0x406   : > { %3286 = vmatpush3.bf16.msra.mxu1 %v2326_v39  ;;  %3078 = vmatmul.mubr.msk.bf16.vlgmr.msra.gmra.mrb[44].mxu0 %vm1852_vm15, %v3076_v35  ;;  %v2561_v43 = vpop.permute.xlu0 %2560  ;;  %v2568_v55 = vsel %vm1856_vm14, %v2562_v52, 0 }
 0x407   : > { %2329 = vmatpush1.bf16.msra.mxu0 %v2320_v40  ;;  %3287 = vmatprep.mubr.msk.bf16.mxu1 %vm3574_vm0, %v3573_v8  ;;  %v2563_v49 = vsel %vm1440_vm10, %v2559_v42, %v2561_v43  ;;  %v2574_v54 = vsel %vm1856_vm14, %v2561_v43, 0 }
 0x408   : > { %3085 = vmatprep.subr.msk.bf16.mxu0 %vm1856_vm14, %v2439_v41  ;;  %3291 = vmatprep.subr.bf16.mxu1 %v3573_v8  ;;  %v2681_v48 = vpop.permute.xlu1 %2680 }
 0x409   : > { %2360 = vmatprep.mubr.bf16.mxu0 %v3576_v10 }
 0x40a   : > { %v2683_v50 = vpop.permute.xlu0 %2682 }
 0x40b   : > { %v2686_v59 = vsel %vm1547_vm11, %v2681_v48, %v2683_v50 }
 0x40c   : > { %v2685_v53 = vpop.permute.xlu1 %2684  ;;  %v2692_v62 = vsel %vm1856_vm14, %v2686_v59, 0 }
 0x40d   : > { %3288 = vmatmul.mubr.msk.bf16.vlgmr.msra.gmra.mrb[64].mxu1 %vm1852_vm15, %v3080_v44  ;;  %v2687_v57 = vsel %vm1547_vm11, %v2683_v50, %v2685_v53  ;;  %v2698_v61 = vsel %vm1856_vm14, %v2685_v53, 0 }
 0x40e   : > { %3292 = vmatpush3.bf16.msra.mxu1 %v2450_v46  ;;  %3082 = vmatmul.mubr.msk.bf16.vlgmr.msra.gmra.mrb[48].mxu0 %vm1852_vm15, %v3080_v44  ;;  %v2805_v56 = vpop.permute.xlu0 %2804 }
 0x40f   : > { %2453 = vmatpush1.bf16.msra.mxu0 %v2444_v47  ;;  %3293 = vmatprep.mubr.msk.bf16.mxu1 %vm3574_vm0, %v3573_v8 }
 0x410   : > { %3089 = vmatprep.subr.msk.bf16.mxu0 %vm1856_vm14, %v2563_v49  ;;  %3297 = vmatprep.subr.bf16.mxu1 %v3573_v8  ;;  %v2807_v63 = vpop.permute.xlu1 %2806 }
 0x411   : > { %2484 = vmatprep.mubr.bf16.mxu0 %v3576_v10  ;;  %v2810_v2 = vsel %vm1654_vm12, %v2805_v56, %v2807_v63 }
 0x412   : > { %v2809_v60 = vpop.permute.xlu0 %2808  ;;  %v2816_v4 = vsel %vm1856_vm14, %v2810_v2, 0 }
 0x413   : > { %v2811_v0 = vsel %vm1654_vm12, %v2807_v63, %v2809_v60  ;;  %v2822_v3 = vsel %vm1856_vm14, %v2809_v60, 0 }
 0x415   : > { %3294 = vmatmul.mubr.msk.bf16.vlgmr.msra.gmra.mrb[68].mxu1 %vm1852_vm15, %v3084_v51 }
 0x416   : > { %3298 = vmatpush3.bf16.msra.mxu1 %v2574_v54  ;;  %3086 = vmatmul.mubr.msk.bf16.vlgmr.msra.gmra.mrb[52].mxu0 %vm1852_vm15, %v3084_v51 }
 0x417   : > { %2577 = vmatpush1.bf16.msra.mxu0 %v2568_v55  ;;  %3299 = vmatprep.mubr.msk.bf16.mxu1 %vm3574_vm0, %v3573_v8 }
 0x418   : > { %3093 = vmatprep.subr.msk.bf16.mxu0 %vm1856_vm14, %v2687_v57  ;;  %3303 = vmatprep.subr.bf16.mxu1 %v3573_v8 }
 0x419   : > { %2608 = vmatprep.mubr.bf16.mxu0 %v3576_v10 }
 0x41d   : > { %3300 = vmatmul.mubr.msk.bf16.vlgmr.msra.gmra.mrb[72].mxu1 %vm1852_vm15, %v3088_v58 }
 0x41e   : > { %3304 = vmatpush3.bf16.msra.mxu1 %v2698_v61  ;;  %3090 = vmatmul.mubr.msk.bf16.vlgmr.msra.gmra.mrb[56].mxu0 %vm1852_vm15, %v3088_v58 }
 0x41f   : > { %2701 = vmatpush1.bf16.msra.mxu0 %v2692_v62  ;;  %3305 = vmatprep.mubr.msk.bf16.mxu1 %vm3574_vm0, %v3573_v8 }
 0x420   : > { %3097 = vmatprep.subr.msk.bf16.mxu0 %vm1856_vm14, %v2811_v0  ;;  %3309 = vmatprep.subr.bf16.mxu1 %v3573_v8 }
 0x421   : > { %2732 = vmatprep.mubr.bf16.mxu0 %v3576_v10 }
 0x425   : > { %3306 = vmatmul.mubr.msk.bf16.vlgmr.msra.gmra.mrb[76].mxu1 %vm1852_vm15, %v3092_v1 }
 0x426   : > { %3310 = vmatpush3.bf16.msra.mxu1 %v2822_v3  ;;  %3094 = vmatmul.mubr.msk.bf16.vlgmr.msra.gmra.mrb[60].mxu0 %vm1852_vm15, %v3092_v1 }
 0x427   : > { %2825 = vmatpush1.bf16.msra.mxu0 %v2816_v4  ;;  %3311 = vmatprep.mubr.msk.bf16.mxu1 %vm3574_vm0, %v3573_v8  ;;  %vm2925_vm0 = vcmask 257024  }
 0x428   : > { %2856 = vmatprep.mubr.bf16.mxu0 %v3576_v10 }
 0x42d   : > { %3312 = vmatmul.mubr.msk.bf16.vlgmr.msra.gmra.mrb[80].mxu1 %vm1852_vm15, %v3096_v5 }
 0x42e   : > { %3098 = vmatmul.mubr.msk.bf16.vlgmr.msra.gmra.mrb[64].mxu0 %vm1852_vm15, %v3096_v5 }
 0x4c0   : > { %v1941_v6 = vpop.f32.mrb[48].mxu1 }
 0x4c1   : > { %v1900_v38 = vpop.f32.mrb[32].mxu0  ;;  %v3265_v7 = vpop.f32.mrb[49].mxu1 }
 0x4c2   : > { %v1902_v9 = vpop.f32.mrb[33].mxu0  ;;  %v1944_v11 = vpop.f32.mrb[50].mxu1 }
 0x4c3   : > { %v1904_v12 = vpop.f32.mrb[34].mxu0  ;;  %v3266_v13 = vpop.f32.mrb[51].mxu1 }
 0x4c4   : > { %v1905_v14 = vpop.f32.mrb[35].mxu0 }
 0x4c8   : > { %v2034_v15 = vpop.f32.mrb[52].mxu1 }
 0x4c9   : > { %v1993_v8 = vpop.f32.mrb[36].mxu0  ;;  %v2035_v16 = vadd.f32 %v2034_v15, %v1941_v6  ;;  %v3271_v10 = vpop.f32.mrb[53].mxu1 }
 0x4ca   : > { %v1994_v17 = vadd.f32 %v1993_v8, %v1900_v38  ;;  %v1995_v18 = vpop.f32.mrb[37].mxu0  ;;  %v2037_v19 = vpop.f32.mrb[54].mxu1 }
 0x4cb   : > { %v1996_v20 = vadd.f32 %v1995_v18, %v1902_v9  ;;  %v1997_v21 = vpop.f32.mrb[38].mxu0  ;;  %v3272_v22 = vpop.f32.mrb[55].mxu1 }
 0x4cc   : > { %v1998_v23 = vpop.f32.mrb[39].mxu0 }
 0x4d0   : > { %v2155_v24 = vpop.f32.mrb[56].mxu1 }
 0x4d1   : > { %v2163_v25 = vadd.f32 %v2155_v24, %v2035_v16  ;;  %v2114_v26 = vpop.f32.mrb[40].mxu0  ;;  %v3277_v27 = vpop.f32.mrb[57].mxu1 }
 0x4d2   : > { %v2161_v28 = vadd.f32 %v2114_v26, %v1994_v17  ;;  %v2116_v29 = vpop.f32.mrb[41].mxu0  ;;  %v2158_v30 = vpop.f32.mrb[58].mxu1 }
 0x4d3   : > { %v2162_v31 = vadd.f32 %v2116_v29, %v1996_v20  ;;  %v2118_v32 = vpop.f32.mrb[42].mxu0  ;;  %v3278_v33 = vpop.f32.mrb[59].mxu1 }
 0x4d4   : > { %v2119_v34 = vpop.f32.mrb[43].mxu0  ;;  %v2912_v27 = vpop.permute.xlu1 %2911 }
 0x4d8   : > { %v2279_v35 = vpop.f32.mrb[60].mxu1 }
 0x4d9   : > { %v2287_v36 = vadd.f32 %v2279_v35, %v2163_v25  ;;  %v2238_v37 = vpop.f32.mrb[44].mxu0  ;;  %v3283_v39 = vpop.f32.mrb[61].mxu1 }
 0x4da   : > { %v2285_v40 = vadd.f32 %v2238_v37, %v2161_v28  ;;  %v2240_v41 = vpop.f32.mrb[45].mxu0  ;;  %v2282_v42 = vpop.f32.mrb[62].mxu1 }
 0x4db   : > { %v2286_v43 = vadd.f32 %v2240_v41, %v2162_v31  ;;  %v2242_v44 = vpop.f32.mrb[46].mxu0  ;;  %v3284_v45 = vpop.f32.mrb[63].mxu1 }
 0x4dc   : > { %v2243_v46 = vpop.f32.mrb[47].mxu0 }
 0x4e0   : > { %v2403_v47 = vpop.f32.mrb[64].mxu1 }
 0x4e1   : > { %v2411_v48 = vadd.f32 %v2403_v47, %v2287_v36  ;;  %v2362_v49 = vpop.f32.mrb[48].mxu0  ;;  %v3289_v50 = vpop.f32.mrb[65].mxu1 }
 0x4e2   : > { %v2409_v51 = vadd.f32 %v2362_v49, %v2285_v40  ;;  %v2364_v52 = vpop.f32.mrb[49].mxu0  ;;  %v2406_v53 = vpop.f32.mrb[66].mxu1 }
 0x4e3   : > { %v2410_v54 = vadd.f32 %v2364_v52, %v2286_v43  ;;  %v2366_v55 = vpop.f32.mrb[50].mxu0  ;;  %v3290_v56 = vpop.f32.mrb[67].mxu1 }
 0x4e4   : > { %v2367_v57 = vpop.f32.mrb[51].mxu0 }
 0x4e8   : > { %v2527_v58 = vpop.f32.mrb[68].mxu1 }
 0x4e9   : > { %v2535_v59 = vadd.f32 %v2527_v58, %v2411_v48  ;;  %v2486_v60 = vpop.f32.mrb[52].mxu0  ;;  %v3295_v61 = vpop.f32.mrb[69].mxu1 }
 0x4ea   : > { %v2533_v62 = vadd.f32 %v2486_v60, %v2409_v51  ;;  %v2488_v63 = vpop.f32.mrb[53].mxu0  ;;  %v2530_v0 = vpop.f32.mrb[70].mxu1 }
 0x4eb   : > { %v2534_v1 = vadd.f32 %v2488_v63, %v2410_v54  ;;  %v2490_v2 = vpop.f32.mrb[54].mxu0  ;;  %v3296_v3 = vpop.f32.mrb[71].mxu1 }
 0x4ec   : > { %v2491_v4 = vpop.f32.mrb[55].mxu0 }
 0x4f0   : > { %v2651_v5 = vpop.f32.mrb[72].mxu1 }
 0x4f1   : > { %v2659_v6 = vadd.f32 %v2651_v5, %v2535_v59  ;;  %v2610_v38 = vpop.f32.mrb[56].mxu0  ;;  %v3301_v7 = vpop.f32.mrb[73].mxu1 }
 0x4f2   : > { %v2657_v9 = vadd.f32 %v2610_v38, %v2533_v62  ;;  %v2612_v11 = vpop.f32.mrb[57].mxu0  ;;  %v2654_v12 = vpop.f32.mrb[74].mxu1 }
 0x4f3   : > { %v2658_v13 = vadd.f32 %v2612_v11, %v2534_v1  ;;  %v2614_v14 = vpop.f32.mrb[58].mxu0  ;;  %v3302_v15 = vpop.f32.mrb[75].mxu1 }
 0x4f4   : > { %v2615_v8 = vpop.f32.mrb[59].mxu0 }
 0x4f8   : > { %v2775_v16 = vpop.f32.mrb[76].mxu1 }
 0x4f9   : > { %v2783_v10 = vadd.f32 %v2775_v16, %v2659_v6  ;;  %v2734_v17 = vpop.f32.mrb[60].mxu0  ;;  %v3307_v18 = vpop.f32.mrb[77].mxu1 }
 0x4fa   : > { %v2781_v19 = vadd.f32 %v2734_v17, %v2657_v9  ;;  %v2736_v20 = vpop.f32.mrb[61].mxu0  ;;  %v2778_v21 = vpop.f32.mrb[78].mxu1 }
 0x4fb   : > { %v2782_v22 = vadd.f32 %v2736_v20, %v2658_v13  ;;  %v2738_v23 = vpop.f32.mrb[62].mxu0  ;;  %v3308_v24 = vpop.f32.mrb[79].mxu1 }
 0x4fc   : > { %v2739_v25 = vpop.f32.mrb[63].mxu0 }
 0x500   : > { %v2899_v26 = vpop.f32.mrb[80].mxu1 }
 0x501   : > { %v2907_v28 = vadd.f32 %v2899_v26, %v2783_v10  ;;  %v2858_v29 = vpop.f32.mrb[64].mxu0  ;;  %v3313_v30 = vpop.f32.mrb[81].mxu1 }
 0x502   : > { %v2905_v31 = vadd.f32 %v2858_v29, %v2781_v19  ;;  %v2860_v32 = vpop.f32.mrb[65].mxu0  ;;  %v2902_v33 = vpop.f32.mrb[82].mxu1 }
 0x503   : > { %v2906_v34 = vadd.f32 %v2860_v32, %v2782_v22  ;;  %v2916_v35 = vadd.f32 %v2912_v27, %v2907_v28  ;;  %v2862_v36 = vpop.f32.mrb[66].mxu0  ;;  %v3314_v37 = vpop.f32.mrb[83].mxu1 }
 0x504   : > { %v2914_v39 = vadd.f32 %v2912_v27, %v2905_v31  ;;  %v2863_v40 = vpop.f32.mrb[67].mxu0 }
 0x505   : > { %v2915_v41 = vadd.f32 %v2912_v27, %v2906_v34  ;;  %v2919_v42 = vmax.f32 %v2916_v35, 0.0 }
 0x506   : > { %v2917_v43 = vmax.f32 %v2914_v39, 0.0 }
 0x507   : > { %v2918_v44 = vmax.f32 %v2915_v41, 0.0  ;;  %2926 = vst.msk [vmem:[%s338_s28 + $0x8] sm:$0xf] %vm2925_vm0, %v2919_v42 }
 0x509   : > { %v2922_v45 = vcombine.low %v2917_v43, %v2918_v44 }
 0x50b   : > { %2924 = vst [vmem:[%s338_s28] sm:$0xff] %v2922_v45 }
 0x50c   : > { %3521 = shalt.err (!%p3518_p3)
}
 0x50d   : > { %s3522_s14 = scalar_lea.hbm %s4460_s29, 192  ;;  %s3526_s18 = scalar_lea.hbm %s4511_s9, 384 }
 0x50e   : > { %p3523_p4 = scmp.ne.s32.totalorder %s4460_s29, %s3522_s14  ;;  %p3527_p9 = scmp.lt.u32.totalorder %s4460_s29, %s4511_s9 }
 0x50f   : > { %p3528_p10 = scmp.lt.u32.totalorder %s3526_s18, %s3522_s14  ;;  %p3530_p12 = scmp.lt.u32.totalorder %s3522_s14, %s4460_s29 }
 0x510   : > { %p3524_p7 = pnand %p3523_p4, %p3675_p5 }
 0x511   : > { %p3529_p11 = por %p3528_p10, %p3527_p9 }
 0x512   : > { %p3525_p8 = pneg %p3524_p7 }
 0x513   : > { %p3531_p13 = por %p3530_p12, %p3529_p11 }
 0x515   : > { %p3532_p0 = pnand %p3531_p13, %p3525_p8 }
 0x517   : > { %3535 = shalt.err (!%p3532_p0)
}
 0x518   : > { %3441 = dma.vmem_to_hbm [thread:$0]  (%p3675_p5), %s4462_s0, 192, %s4460_s29, %s2928_s21  }
 0x519 PF: > { %p3447_p1 = scmp.ge.s32.totalorder %s3570_s12, 2  ;;  %s2954_s16 = sand.u32 1, %s3558_s30  }
 0x51a   : > { %s2955_s27 = scalar_lea.sflag [#allocation5], %s2954_s16 }
 0x51b   : > { %p3444_p2 = pnand %p3447_p1, %p3679_p6 }
 0x51d   : > { %3553 = dma.done.wait (!%p3444_p2), %s2955_s27, 192  }
 0x51e   : > { %3555 = vsyncadd (!%p3444_p2), %s2955_s27, 4294967104  ;;  %s4517_s22 = sld [smem:[#allocation7_spill]]  ;;  %p19_p3 = scmp.ge.s32.totalorder %s3662_s15, 4  }
 0x51f   : > { %s4518_s30 = smov %s3562_s10  ;;  %s4519_s10 = smov %s3566_s11 }
 0x520   : > { %s4521_s12 = smov %s3662_s15  ;;  %21 = sbr.rel (!%p19_p3) target bundleno = 5 (0x5), region = 110 }
 0x524   : > { %s4520_s11 = smov %s4517_s22 }
 0x527   :  { %2960 = vsyncpa [#allocation5], 1 }
 0x528   :  { %2962 = vsyncpa [#allocation5 + $0x1], 1 }

</bundles_post_ra>
